<compile_context>
chip_gen: v7x
topology: tpu7x:2x2x1
jax: 0.10.0
libtpu: 0.0.40
codegen_flags: <defaults>
</compile_context>

<pallas_src>
import functools
import math

import jax
import jax.numpy as jnp
from jax import lax
from jax.experimental import pallas as pl
from jax.experimental.pallas import tpu as pltpu

# ----------------------------------------------------------------------------
# Compile-time audio-config constants (defaults of the PyTorch module).
# ----------------------------------------------------------------------------
SR = 48000.0
MIN_W_HZ, MAX_W_HZ = 100.0, 8000.0
MIN_Q, MAX_Q = 0.7071, 8.0
MIN_MIDI_F0, MAX_MIDI_F0 = 30, 60
MIN_ALPHA, MAX_ALPHA = 0.2, 3.0
NOTE_ON_DURATION = 0.125
OSC_SHAPE = 1.0
OSC_GAIN = 0.5
DIST_GAIN = 1.0

_LANES = 128
_TWO_PI = 2.0 * math.pi


# ----------------------------------------------------------------------------
# Fused kernel.  All per-sample signals are (R, 128) f32 with R = T // 128:
# row = coarse time, lane = fine time (sublane-dense layout).
#
# params (SMEM, f32[11]):
#   0: phase0 / (2*pi)              (oscillator phase, in cycles)
#   1: f0 / SR                      (cycles per sample)
#   2: osc_shape       3: osc_gain       4: dist_gain
#   5: zi y[-2]        6: zi y[-1]
#   7: alpha (envelope exponent)
#   8: cont_start      9: cont_len       (envelope continuation scalars)
#  10: square-wave tanh drive  pi*SR/(4*f0)
# ----------------------------------------------------------------------------
def _acid_fused_kernel(params_ref, x_ref, w_ref, q_ref, wet_ref, tail_ref,
                       *, note_on_samples):
    R, L = x_ref.shape
    T = R * L
    N = float(note_on_samples)

    phase_cyc0 = params_ref[0]
    dphi = params_ref[1]
    osc_shape = params_ref[2]
    osc_gain = params_ref[3]
    dist_gain = params_ref[4]
    zi_ym2 = params_ref[5]
    zi_ym1 = params_ref[6]
    alpha = params_ref[7]
    cont_start = params_ref[8]
    cont_len = params_ref[9]
    sq_drive = params_ref[10]

    lane = lax.broadcasted_iota(jnp.int32, (R, L), 1)
    row = lax.broadcasted_iota(jnp.int32, (R, L), 0)
    abs_i = row * L + lane                      # flattened sample index
    abs_f = abs_i.astype(jnp.float32)

    def floor_mod_n(v):                         # v mod N, result in [0, N)
        return v - N * jnp.floor(v * (1.0 / N))

    # ---------------- envelope (device port of make_envelope) ----------------
    x = x_ref[...]
    nz_pos = jnp.where(x != 0.0, abs_f, float(T))
    fnz = jnp.min(jnp.min(nz_pos, axis=1, keepdims=True),
                  axis=0, keepdims=True)                        # (1, 1)
    # first_nonzero == 0  ->  the continuation ramp runs for the whole block.
    cont_len_eff = jnp.where(fnz == 0.0, float(T), cont_len)    # (1, 1)
    fnz_eff = jnp.maximum(fnz, cont_len_eff)                    # (1, 1)

    inv_nm1 = 1.0 / (N - 1.0)
    ramp_cont = 1.0 - floor_mod_n(cont_start + abs_f) * inv_nm1
    ramp_retrig = 1.0 - floor_mod_n(abs_f - fnz_eff) * inv_nm1
    env = jnp.where(abs_f < cont_len_eff, ramp_cont,
          jnp.where(abs_f >= fnz_eff, ramp_retrig, 0.0))
    env_pow = jnp.where(env > 0.0,
                        jnp.exp(alpha * jnp.log(jnp.maximum(env, 1e-30))),
                        0.0)

    # ---------------- oscillator (range-reduced phase) -----------------------
    # TODO(synk): SquareSawVCO source not provided; square/saw blend is a
    #             reasonable reconstruction, not a bit-exact port.
    ph_cycles = phase_cyc0 + dphi * (abs_f + 1.0)
    ph_frac = ph_cycles - jnp.floor(ph_cycles)
    arg = _TWO_PI * ph_frac
    square = jnp.tanh(sq_drive * jnp.sin(arg))
    osc = (1.0 - 0.5 * osc_shape) * square * (1.0 + osc_shape * jnp.cos(arg))
    dry = osc * env_pow * osc_gain

    # ------------- time-varying RBJ low-pass coefficients (a0-normalised) ----
    # TODO(synk): stability_eps pole clamping of the reference is not ported.
    w_hz = MIN_W_HZ + w_ref[...] * (MAX_W_HZ - MIN_W_HZ)
    q_f = MIN_Q + q_ref[...] * (MAX_Q - MIN_Q)
    omega = (_TWO_PI / SR) * w_hz
    cosw = jnp.cos(omega)
    sinw = jnp.sin(omega)
    alpha_f = sinw / (2.0 * q_f)
    inv_a0 = 1.0 / (1.0 + alpha_f)        # exact reciprocal: feeds pole locations
    one_m_cosw = 1.0 - cosw
    b0 = 0.5 * one_m_cosw * inv_a0
    b1 = one_m_cosw * inv_a0
    a1 = (-2.0 * cosw) * inv_a0
    a2 = (1.0 - alpha_f) * inv_a0

    # ------------- FIR half of the biquad ------------------------------------
    # TODO(synk): x[-1]/x[-2] FIR history resets each block; only the pole
    #             state zi carries across blocks.
    def shift_time(v, d):                 # v delayed by d samples, zero fill
        r_lane = pltpu.roll(v, shift=d, axis=1)
        r_wrap = pltpu.roll(r_lane, shift=1, axis=0)   # previous row's tail
        out = jnp.where(lane >= d, r_lane, r_wrap)
        return jnp.where(abs_i >= d, out, 0.0)

    x_fir = b0 * dry + b1 * shift_time(dry, 1) + b0 * shift_time(dry, 2)  # b2==b0

    # ------------- level 1: within-row (lane-axis) affine scan ---------------
    #   s[n] = M[n] s[n-1] + b[n],  s[n] = [y[n], y[n-1]],
    #   M[n] = [[-a1, -a2], [1, 0]],  b[n] = [x_fir[n], 0].
    p00, p01 = -a1, -a2
    q0 = x_fir

    # peeled first step (d = 1), exploiting p10 = 1, p11 = 0, q1 = 0.
    v1 = lane >= 1
    v1f = v1.astype(jnp.float32)
    ps00 = jnp.where(v1, pltpu.roll(p00, shift=1, axis=1), 1.0)
    ps01 = jnp.where(v1, pltpu.roll(p01, shift=1, axis=1), 0.0)
    qs0 = jnp.where(v1, pltpu.roll(q0, shift=1, axis=1), 0.0)
    n00 = p00 * ps00 + p01 * v1f
    n01 = p00 * ps01 + p01 * (1.0 - v1f)
    n10 = ps00
    n11 = ps01
    nq0 = p00 * qs0 + q0
    nq1 = qs0
    p00, p01, p10, p11, q0, q1 = n00, n01, n10, n11, nq0, nq1

    d = 2
    while d < L:                          # static unroll: log2(128) - 1 steps
        valid = lane >= d
        ps00 = jnp.where(valid, pltpu.roll(p00, shift=d, axis=1), 1.0)
        ps01 = jnp.where(valid, pltpu.roll(p01, shift=d, axis=1), 0.0)
        ps10 = jnp.where(valid, pltpu.roll(p10, shift=d, axis=1), 0.0)
        ps11 = jnp.where(valid, pltpu.roll(p11, shift=d, axis=1), 1.0)
        qs0 = jnp.where(valid, pltpu.roll(q0, shift=d, axis=1), 0.0)
        qs1 = jnp.where(valid, pltpu.roll(q1, shift=d, axis=1), 0.0)
        n00 = p00 * ps00 + p01 * ps10
        n01 = p00 * ps01 + p01 * ps11
        n10 = p10 * ps00 + p11 * ps10
        n11 = p10 * ps01 + p11 * ps11
        nq0 = p00 * qs0 + p01 * qs1 + q0
        nq1 = p10 * qs0 + p11 * qs1 + q1
        p00, p01, p10, p11, q0, q1 = n00, n01, n10, n11, nq0, nq1
        d *= 2

    # ------------- level 2: cross-row (sublane-axis) scan of row carries -----
    def lane_last(v):
        # value at lane L-1 of each row, broadcast back across the row's lanes.
        sel = jnp.where(lane == L - 1, v, 0.0)
        return jnp.broadcast_to(jnp.sum(sel, axis=1, keepdims=True), (R, L))

    f00, f01 = lane_last(p00), lane_last(p01)
    f10, f11 = lane_last(p10), lane_last(p11)
    g0, g1 = lane_last(q0), lane_last(q1)

    dr = 1
    while dr < R:                         # static unroll: ceil(log2(T/128))
        validr = row >= dr
        fs00 = jnp.where(validr, pltpu.roll(f00, shift=dr, axis=0), 1.0)
        fs01 = jnp.where(validr, pltpu.roll(f01, shift=dr, axis=0), 0.0)
        fs10 = jnp.where(validr, pltpu.roll(f10, shift=dr, axis=0), 0.0)
        fs11 = jnp.where(validr, pltpu.roll(f11, shift=dr, axis=0), 1.0)
        gs0 = jnp.where(validr, pltpu.roll(g0, shift=dr, axis=0), 0.0)
        gs1 = jnp.where(validr, pltpu.roll(g1, shift=dr, axis=0), 0.0)
        m00 = f00 * fs00 + f01 * fs10
        m01 = f00 * fs01 + f01 * fs11
        m10 = f10 * fs00 + f11 * fs10
        m11 = f10 * fs01 + f11 * fs11
        h0 = f00 * gs0 + f01 * gs1 + g0
        h1 = f10 * gs0 + f11 * gs1 + g1
        f00, f01, f10, f11, g0, g1 = m00, m01, m10, m11, h0, h1
        dr *= 2

    # y state at the end of each row, given the carried-in block state zi.
    y_end0 = f00 * zi_ym1 + f01 * zi_ym2 + g0     # y[(r+1)*L - 1]
    y_end1 = f10 * zi_ym1 + f11 * zi_ym2 + g1     # y[(r+1)*L - 2]
    # y state just before each row starts.
    not_first = row >= 1
    s_prev0 = jnp.where(not_first, pltpu.roll(y_end0, shift=1, axis=0), zi_ym1)
    s_prev1 = jnp.where(not_first, pltpu.roll(y_end1, shift=1, axis=0), zi_ym2)

    # TODO(synk): the log-depth prefix product in f32 should be validated
    #             against a sequential reference at Q ~= MAX_Q (poles near the
    #             unit circle) before shipping.
    y = p00 * s_prev0 + p01 * s_prev1 + q0

    # ------------- outputs ----------------------------------------------------
    wet_ref[...] = jnp.tanh(dist_gain * y)

    def row_last(v):                      # last row of v, shape (1, L)
        sel = jnp.where(row == R - 1, v, 0.0)
        return jnp.sum(sel, axis=0, keepdims=True)

    # tail slab: row 0 -> last row of y (new zi at lanes L-2, L-1),
    #            row 1 -> last row of the raw envelope (new curr_env_val at L-1)
    tail_ref[...] = jnp.concatenate([row_last(y), row_last(env)], axis=0)


# ----------------------------------------------------------------------------
# Hot path: one grid-less pallas_call.
# TODO(synk): for very long blocks (T >~ 512K samples) add a time-tiled
#             sequential grid carrying (y[-1], y[-2]) in SMEM scratch, and a
#             'parallel' batch/voice axis to use both v7x TensorCores.
# ----------------------------------------------------------------------------
def _acid_hotpath(params, x2, w2, q2, *, note_on_samples):
    R, L = x2.shape
    vmem = pl.BlockSpec(memory_space=pltpu.MemorySpace.VMEM)
    smem = pl.BlockSpec(memory_space=pltpu.MemorySpace.SMEM)
    # ~30 live (R, L) f32 temporaries at scan peak; leave 2x headroom.
    vmem_limit = int(min(48 * 1024 * 1024, max(8 * 1024 * 1024, 64 * R * L * 4)))
    return pl.pallas_call(
        functools.partial(_acid_fused_kernel, note_on_samples=note_on_samples),
        out_shape=(jax.ShapeDtypeStruct((R, L), jnp.float32),
                   jax.ShapeDtypeStruct((2, L), jnp.float32)),
        in_specs=[smem, vmem, vmem, vmem],
        out_specs=(vmem, vmem),
        compiler_params=pltpu.CompilerParams(vmem_limit_bytes=vmem_limit),
    )(params, x2, w2, q2)


# ----------------------------------------------------------------------------
# Fully on-device forward step (one kernel launch + scalar state math).
# ----------------------------------------------------------------------------
@functools.partial(jax.jit, static_argnames=("note_on_samples",))
def acid_forward(x, midi_f0_0to1, alpha_0to1, w_mod_sig, q_mod_sig,
                 phase, zi, curr_env_val, *, note_on_samples):
    T = x.shape[-1]
    if T % _LANES != 0:
        # TODO(synk): pad/split support for block sizes not a multiple of 128.
        raise ValueError(f"n_samples must be a multiple of {_LANES}, got {T}")
    R = T // _LANES
    N = note_on_samples
    f32 = jnp.float32

    alpha = alpha_0to1 * (MAX_ALPHA - MIN_ALPHA) + MIN_ALPHA
    midi_f0 = jnp.round(midi_f0_0to1 * (MAX_MIDI_F0 - MIN_MIDI_F0) + MIN_MIDI_F0)
    f0_hz = 440.0 * jnp.exp2((midi_f0 - 69.0) / 12.0)      # librosa.midi_to_hz

    # Envelope-continuation scalars (same scalar math as torch make_envelope).
    has_cont = curr_env_val != 0.0
    cont_start = jnp.clip(jnp.round((1.0 - curr_env_val) * (N - 1)),
                          0.0, float(N - 1))
    cont_start = jnp.where(has_cont, cont_start, 0.0)
    cont_len = jnp.where(has_cont, jnp.minimum(float(T), N - cont_start), 0.0)

    f0_f = jnp.asarray(f0_hz, f32)
    params = jnp.stack([
        jnp.asarray(phase, f32) / f32(_TWO_PI),            # phase, cycles
        f0_f / f32(SR),                                    # cycles / sample
        f32(OSC_SHAPE),
        f32(OSC_GAIN),
        f32(DIST_GAIN),
        jnp.asarray(zi[0, 0], f32),                        # y[-2]
        jnp.asarray(zi[0, 1], f32),                        # y[-1]
        jnp.asarray(alpha, f32),
        jnp.asarray(cont_start, f32),
        jnp.asarray(cont_len, f32),
        f32(math.pi) * f32(SR) / (4.0 * f0_f),             # square tanh drive
    ])

    x2 = jnp.reshape(x.astype(f32), (R, _LANES))
    w2 = jnp.reshape(w_mod_sig.astype(f32), (R, _LANES))
    q2 = jnp.reshape(q_mod_sig.astype(f32), (R, _LANES))

    wet2, tail = _acid_hotpath(params, x2, w2, q2,
                               note_on_samples=note_on_samples)

    wet = jnp.reshape(wet2, (1, T))
    new_zi = tail[0:1, _LANES - 2:_LANES]                  # [[y[T-2], y[T-1]]]
    new_env_val = tail[1, _LANES - 1]                      # raw env at T-1

    period_completion = jnp.mod(T * f0_hz / SR, 1.0)
    # TODO(synk): torch accumulates phase unwrapped in float64; kept f32 and
    #             wrapped mod 2*pi here (identical oscillator output).
    new_phase = jnp.mod(jnp.asarray(phase, f32)
                        + f32(_TWO_PI) * period_completion.astype(f32),
                        f32(_TWO_PI))
    return wet, new_phase, new_zi, new_env_val


# ----------------------------------------------------------------------------
# Stateful wrapper mirroring the PyTorch AcidSynth module (use_fs=False path).
# ----------------------------------------------------------------------------
class AcidSynthPallas:
    def __init__(self):
        self.note_on_samples = int(NOTE_ON_DURATION * SR)
        self.reset()

    def reset(self):
        self.curr_env_val = jnp.float32(1.0)
        self.phase = jnp.float32(0.0)
        self.zi = jnp.zeros((1, 2), jnp.float32)

    def forward(self, x, midi_f0_0to1, alpha_0to1, w_mod_sig, q_mod_sig):
        wet, self.phase, self.zi, self.curr_env_val = acid_forward(
            x, midi_f0_0to1, alpha_0to1, w_mod_sig, q_mod_sig,
            self.phase, self.zi, self.curr_env_val,
            note_on_samples=self.note_on_samples)
        return wet


# ----------------------------------------------------------------------------
# Demo
# ----------------------------------------------------------------------------
if __name__ == "__main__":
    key = jax.random.PRNGKey(0)
    k1, k2 = jax.random.split(key)

    T = 1024                                               # 8 rows x 128 lanes
    x = jnp.ones((1, T), jnp.float32)                      # note-on gate signal
    midi_f0_0to1 = jnp.float32(0.5)
    alpha_0to1 = jnp.float32(0.3)
    w_mod_sig = jax.random.uniform(k1, (1, T), dtype=jnp.float32)
    q_mod_sig = jax.random.uniform(k2, (1, T), dtype=jnp.float32)

    synth = AcidSynthPallas()
    wet = synth.forward(x, midi_f0_0to1, alpha_0to1, w_mod_sig, q_mod_sig)
    wet = jax.block_until_ready(wet)
    assert wet.shape == (1, T)
    assert wet.dtype == jnp.float32
    assert bool(jnp.all(jnp.isfinite(wet)))

    # Second call exercises the carried state path (zi, phase, curr_env_val).
    wet2 = synth.forward(x, midi_f0_0to1, alpha_0to1, w_mod_sig, q_mod_sig)
    wet2 = jax.block_until_ready(wet2)
    assert wet2.shape == (1, T)
    assert bool(jnp.all(jnp.isfinite(wet2)))

    print("KERNEL_OK")
</pallas_src>

<mosaic_0001>
module attributes {stable_mosaic.version = 11 : i64} {
  func.func @_acid_fused_kernel(%arg0: memref<11xf32, #tpu.memory_space<smem>>, %arg1: memref<8x128xf32, #tpu.memory_space<vmem>>, %arg2: memref<8x128xf32, #tpu.memory_space<vmem>>, %arg3: memref<8x128xf32, #tpu.memory_space<vmem>>, %arg4: memref<8x128xf32, #tpu.memory_space<vmem>>, %arg5: memref<2x128xf32, #tpu.memory_space<vmem>>) attributes {dimension_semantics = [], scalar_prefetch = 0 : i64, scratch_operands = 0 : i64, tpu.core_type = #tpu.core_type<tc>} {
    %c0 = arith.constant 0 : index
    %0 = memref.load %arg0[%c0] : memref<11xf32, #tpu.memory_space<smem>>
    %c1 = arith.constant 1 : index
    %1 = memref.load %arg0[%c1] : memref<11xf32, #tpu.memory_space<smem>>
    %c2 = arith.constant 2 : index
    %2 = memref.load %arg0[%c2] : memref<11xf32, #tpu.memory_space<smem>>
    %c3 = arith.constant 3 : index
    %3 = memref.load %arg0[%c3] : memref<11xf32, #tpu.memory_space<smem>>
    %c4 = arith.constant 4 : index
    %4 = memref.load %arg0[%c4] : memref<11xf32, #tpu.memory_space<smem>>
    %c5 = arith.constant 5 : index
    %5 = memref.load %arg0[%c5] : memref<11xf32, #tpu.memory_space<smem>>
    %c6 = arith.constant 6 : index
    %6 = memref.load %arg0[%c6] : memref<11xf32, #tpu.memory_space<smem>>
    %c7 = arith.constant 7 : index
    %7 = memref.load %arg0[%c7] : memref<11xf32, #tpu.memory_space<smem>>
    %c8 = arith.constant 8 : index
    %8 = memref.load %arg0[%c8] : memref<11xf32, #tpu.memory_space<smem>>
    %c9 = arith.constant 9 : index
    %9 = memref.load %arg0[%c9] : memref<11xf32, #tpu.memory_space<smem>>
    %c10 = arith.constant 10 : index
    %10 = memref.load %arg0[%c10] : memref<11xf32, #tpu.memory_space<smem>>
    %11 = tpu.iota {dimensions = array<i32: 1>} : vector<8x128xi32>
    %12 = tpu.iota {dimensions = array<i32: 0>} : vector<8x128xi32>
    %c128_i32 = arith.constant 128 : i32
    %13 = vector.broadcast %c128_i32 : i32 to vector<8x128xi32>
    %14 = arith.muli %12, %13 : vector<8x128xi32>
    %15 = arith.addi %14, %11 : vector<8x128xi32>
    %16 = arith.sitofp %15 : vector<8x128xi32> to vector<8x128xf32>
    %c0_0 = arith.constant 0 : index
    %c0_1 = arith.constant 0 : index
    %17 = vector.load %arg1[%c0_0, %c0_1] : memref<8x128xf32, #tpu.memory_space<vmem>>, vector<8x128xf32>
    %cst = arith.constant 0.000000e+00 : f32
    %18 = vector.broadcast %cst : f32 to vector<8x128xf32>
    %19 = arith.cmpf one, %17, %18 : vector<8x128xf32>
    %cst_2 = arith.constant 1.024000e+03 : f32
    %20 = vector.broadcast %cst_2 : f32 to vector<8x128xf32>
    %21 = arith.select %19, %16, %20 : vector<8x128xi1>, vector<8x128xf32>
    %cst_3 = arith.constant dense<0x7F800000> : vector<8xf32>
    %22 = vector.multi_reduction <minimumf>, %21, %cst_3 [1] : vector<8x128xf32> to vector<8xf32>
    %23 = vector.shape_cast %22 : vector<8xf32> to vector<8x1xf32>
    %cst_4 = arith.constant dense<0x7F800000> : vector<1xf32>
    %24 = vector.multi_reduction <minimumf>, %23, %cst_4 [0] : vector<8x1xf32> to vector<1xf32>
    %25 = vector.shape_cast %24 : vector<1xf32> to vector<1x1xf32>
    %cst_5 = arith.constant 0.000000e+00 : f32
    %26 = vector.broadcast %cst_5 : f32 to vector<1x1xf32>
    %27 = arith.cmpf oeq, %25, %26 : vector<1x1xf32>
    %cst_6 = arith.constant 1.024000e+03 : f32
    %28 = vector.broadcast %cst_6 : f32 to vector<1x1xf32>
    %29 = vector.broadcast %9 : f32 to vector<1x1xf32>
    %30 = arith.select %27, %28, %29 : vector<1x1xi1>, vector<1x1xf32>
    %31 = arith.maximumf %25, %30 : vector<1x1xf32>
    %32 = vector.broadcast %8 : f32 to vector<8x128xf32>
    %33 = arith.addf %32, %16 : vector<8x128xf32>
    %cst_7 = arith.constant 1.66666665E-4 : f32
    %34 = vector.broadcast %cst_7 : f32 to vector<8x128xf32>
    %35 = arith.mulf %33, %34 : vector<8x128xf32>
    %36 = math.floor %35 : vector<8x128xf32>
    %cst_8 = arith.constant 6.000000e+03 : f32
    %37 = vector.broadcast %cst_8 : f32 to vector<8x128xf32>
    %38 = arith.mulf %37, %36 : vector<8x128xf32>
    %39 = arith.subf %33, %38 : vector<8x128xf32>
    %cst_9 = arith.constant 1.66694444E-4 : f32
    %40 = vector.broadcast %cst_9 : f32 to vector<8x128xf32>
    %41 = arith.mulf %39, %40 : vector<8x128xf32>
    %cst_10 = arith.constant 1.000000e+00 : f32
    %42 = vector.broadcast %cst_10 : f32 to vector<8x128xf32>
    %43 = arith.subf %42, %41 : vector<8x128xf32>
    %44 = vector.broadcast %31 : vector<1x1xf32> to vector<8x128xf32>
    %45 = arith.subf %16, %44 : vector<8x128xf32>
    %cst_11 = arith.constant 1.66666665E-4 : f32
    %46 = vector.broadcast %cst_11 : f32 to vector<8x128xf32>
    %47 = arith.mulf %45, %46 : vector<8x128xf32>
    %48 = math.floor %47 : vector<8x128xf32>
    %cst_12 = arith.constant 6.000000e+03 : f32
    %49 = vector.broadcast %cst_12 : f32 to vector<8x128xf32>
    %50 = arith.mulf %49, %48 : vector<8x128xf32>
    %51 = arith.subf %45, %50 : vector<8x128xf32>
    %cst_13 = arith.constant 1.66694444E-4 : f32
    %52 = vector.broadcast %cst_13 : f32 to vector<8x128xf32>
    %53 = arith.mulf %51, %52 : vector<8x128xf32>
    %cst_14 = arith.constant 1.000000e+00 : f32
    %54 = vector.broadcast %cst_14 : f32 to vector<8x128xf32>
    %55 = arith.subf %54, %53 : vector<8x128xf32>
    %56 = vector.broadcast %30 : vector<1x1xf32> to vector<8x128xf32>
    %57 = arith.cmpf olt, %16, %56 : vector<8x128xf32>
    %58 = vector.broadcast %31 : vector<1x1xf32> to vector<8x128xf32>
    %59 = arith.cmpf oge, %16, %58 : vector<8x128xf32>
    %cst_15 = arith.constant 0.000000e+00 : f32
    %60 = vector.broadcast %cst_15 : f32 to vector<8x128xf32>
    %61 = arith.select %59, %55, %60 : vector<8x128xi1>, vector<8x128xf32>
    %62 = arith.select %57, %43, %61 : vector<8x128xi1>, vector<8x128xf32>
    %cst_16 = arith.constant 0.000000e+00 : f32
    %63 = vector.broadcast %cst_16 : f32 to vector<8x128xf32>
    %64 = arith.cmpf ogt, %62, %63 : vector<8x128xf32>
    %cst_17 = arith.constant 1.000000e-30 : f32
    %65 = vector.broadcast %cst_17 : f32 to vector<8x128xf32>
    %66 = arith.maximumf %62, %65 : vector<8x128xf32>
    %67 = math.log %66 : vector<8x128xf32>
    %68 = vector.broadcast %7 : f32 to vector<8x128xf32>
    %69 = arith.mulf %68, %67 : vector<8x128xf32>
    %70 = math.exp %69 : vector<8x128xf32>
    %cst_18 = arith.constant 0.000000e+00 : f32
    %71 = vector.broadcast %cst_18 : f32 to vector<8x128xf32>
    %72 = arith.select %64, %70, %71 : vector<8x128xi1>, vector<8x128xf32>
    %cst_19 = arith.constant 1.000000e+00 : f32
    %73 = vector.broadcast %cst_19 : f32 to vector<8x128xf32>
    %74 = arith.addf %16, %73 : vector<8x128xf32>
    %75 = vector.broadcast %1 : f32 to vector<8x128xf32>
    %76 = arith.mulf %75, %74 : vector<8x128xf32>
    %77 = vector.broadcast %0 : f32 to vector<8x128xf32>
    %78 = arith.addf %77, %76 : vector<8x128xf32>
    %79 = math.floor %78 : vector<8x128xf32>
    %80 = arith.subf %78, %79 : vector<8x128xf32>
    %cst_20 = arith.constant 6.28318548 : f32
    %81 = vector.broadcast %cst_20 : f32 to vector<8x128xf32>
    %82 = arith.mulf %81, %80 : vector<8x128xf32>
    %83 = math.sin %82 : vector<8x128xf32>
    %84 = vector.broadcast %10 : f32 to vector<8x128xf32>
    %85 = arith.mulf %84, %83 : vector<8x128xf32>
    %86 = math.tanh %85 : vector<8x128xf32>
    %cst_21 = arith.constant 5.000000e-01 : f32
    %87 = arith.mulf %cst_21, %2 : f32
    %cst_22 = arith.constant 1.000000e+00 : f32
    %88 = arith.subf %cst_22, %87 : f32
    %89 = vector.broadcast %88 : f32 to vector<8x128xf32>
    %90 = arith.mulf %89, %86 : vector<8x128xf32>
    %91 = math.cos %82 : vector<8x128xf32>
    %92 = vector.broadcast %2 : f32 to vector<8x128xf32>
    %93 = arith.mulf %92, %91 : vector<8x128xf32>
    %cst_23 = arith.constant 1.000000e+00 : f32
    %94 = vector.broadcast %cst_23 : f32 to vector<8x128xf32>
    %95 = arith.addf %94, %93 : vector<8x128xf32>
    %96 = arith.mulf %90, %95 : vector<8x128xf32>
    %97 = arith.mulf %96, %72 : vector<8x128xf32>
    %98 = vector.broadcast %3 : f32 to vector<8x128xf32>
    %99 = arith.mulf %97, %98 : vector<8x128xf32>
    %c0_24 = arith.constant 0 : index
    %c0_25 = arith.constant 0 : index
    %100 = vector.load %arg2[%c0_24, %c0_25] : memref<8x128xf32, #tpu.memory_space<vmem>>, vector<8x128xf32>
    %cst_26 = arith.constant 7.900000e+03 : f32
    %101 = vector.broadcast %cst_26 : f32 to vector<8x128xf32>
    %102 = arith.mulf %100, %101 : vector<8x128xf32>
    %cst_27 = arith.constant 1.000000e+02 : f32
    %103 = vector.broadcast %cst_27 : f32 to vector<8x128xf32>
    %104 = arith.addf %103, %102 : vector<8x128xf32>
    %c0_28 = arith.constant 0 : index
    %c0_29 = arith.constant 0 : index
    %105 = vector.load %arg3[%c0_28, %c0_29] : memref<8x128xf32, #tpu.memory_space<vmem>>, vector<8x128xf32>
    %cst_30 = arith.constant 7.292900e+00 : f32
    %106 = vector.broadcast %cst_30 : f32 to vector<8x128xf32>
    %107 = arith.mulf %105, %106 : vector<8x128xf32>
    %cst_31 = arith.constant 0.707099974 : f32
    %108 = vector.broadcast %cst_31 : f32 to vector<8x128xf32>
    %109 = arith.addf %108, %107 : vector<8x128xf32>
    %cst_32 = arith.constant 1.30899687E-4 : f32
    %110 = vector.broadcast %cst_32 : f32 to vector<8x128xf32>
    %111 = arith.mulf %110, %104 : vector<8x128xf32>
    %112 = math.cos %111 : vector<8x128xf32>
    %113 = math.sin %111 : vector<8x128xf32>
    %cst_33 = arith.constant 2.000000e+00 : f32
    %114 = vector.broadcast %cst_33 : f32 to vector<8x128xf32>
    %115 = arith.mulf %114, %109 : vector<8x128xf32>
    %116 = arith.divf %113, %115 : vector<8x128xf32>
    %cst_34 = arith.constant 1.000000e+00 : f32
    %117 = vector.broadcast %cst_34 : f32 to vector<8x128xf32>
    %118 = arith.addf %117, %116 : vector<8x128xf32>
    %cst_35 = arith.constant 1.000000e+00 : f32
    %119 = vector.broadcast %cst_35 : f32 to vector<8x128xf32>
    %120 = arith.divf %119, %118 : vector<8x128xf32>
    %cst_36 = arith.constant 1.000000e+00 : f32
    %121 = vector.broadcast %cst_36 : f32 to vector<8x128xf32>
    %122 = arith.subf %121, %112 : vector<8x128xf32>
    %cst_37 = arith.constant 5.000000e-01 : f32
    %123 = vector.broadcast %cst_37 : f32 to vector<8x128xf32>
    %124 = arith.mulf %123, %122 : vector<8x128xf32>
    %125 = arith.mulf %124, %120 : vector<8x128xf32>
    %126 = arith.mulf %122, %120 : vector<8x128xf32>
    %cst_38 = arith.constant -2.000000e+00 : f32
    %127 = vector.broadcast %cst_38 : f32 to vector<8x128xf32>
    %128 = arith.mulf %127, %112 : vector<8x128xf32>
    %129 = arith.mulf %128, %120 : vector<8x128xf32>
    %cst_39 = arith.constant 1.000000e+00 : f32
    %130 = vector.broadcast %cst_39 : f32 to vector<8x128xf32>
    %131 = arith.subf %130, %116 : vector<8x128xf32>
    %132 = arith.mulf %131, %120 : vector<8x128xf32>
    %133 = arith.mulf %125, %99 : vector<8x128xf32>
    %c1_i32 = arith.constant 1 : i32
    %134 = tpu.dynamic_rotate %99 by %c1_i32 dim 1 : vector<8x128xf32>, i32 -> vector<8x128xf32>
    %c1_i32_40 = arith.constant 1 : i32
    %135 = tpu.dynamic_rotate %134 by %c1_i32_40 dim 0 : vector<8x128xf32>, i32 -> vector<8x128xf32>
    %c1_i32_41 = arith.constant 1 : i32
    %136 = vector.broadcast %c1_i32_41 : i32 to vector<8x128xi32>
    %137 = arith.cmpi sge, %11, %136 : vector<8x128xi32>
    %138 = arith.select %137, %134, %135 : vector<8x128xi1>, vector<8x128xf32>
    %c1_i32_42 = arith.constant 1 : i32
    %139 = vector.broadcast %c1_i32_42 : i32 to vector<8x128xi32>
    %140 = arith.cmpi sge, %15, %139 : vector<8x128xi32>
    %cst_43 = arith.constant 0.000000e+00 : f32
    %141 = vector.broadcast %cst_43 : f32 to vector<8x128xf32>
    %142 = arith.select %140, %138, %141 : vector<8x128xi1>, vector<8x128xf32>
    %143 = arith.mulf %126, %142 : vector<8x128xf32>
    %144 = arith.addf %133, %143 : vector<8x128xf32>
    %c2_i32 = arith.constant 2 : i32
    %145 = tpu.dynamic_rotate %99 by %c2_i32 dim 1 : vector<8x128xf32>, i32 -> vector<8x128xf32>
    %c1_i32_44 = arith.constant 1 : i32
    %146 = tpu.dynamic_rotate %145 by %c1_i32_44 dim 0 : vector<8x128xf32>, i32 -> vector<8x128xf32>
    %c2_i32_45 = arith.constant 2 : i32
    %147 = vector.broadcast %c2_i32_45 : i32 to vector<8x128xi32>
    %148 = arith.cmpi sge, %11, %147 : vector<8x128xi32>
    %149 = arith.select %148, %145, %146 : vector<8x128xi1>, vector<8x128xf32>
    %c2_i32_46 = arith.constant 2 : i32
    %150 = vector.broadcast %c2_i32_46 : i32 to vector<8x128xi32>
    %151 = arith.cmpi sge, %15, %150 : vector<8x128xi32>
    %cst_47 = arith.constant 0.000000e+00 : f32
    %152 = vector.broadcast %cst_47 : f32 to vector<8x128xf32>
    %153 = arith.select %151, %149, %152 : vector<8x128xi1>, vector<8x128xf32>
    %154 = arith.mulf %125, %153 : vector<8x128xf32>
    %155 = arith.addf %144, %154 : vector<8x128xf32>
    %cst_48 = arith.constant 0.000000e+00 : f32
    %156 = vector.broadcast %cst_48 : f32 to vector<8x128xf32>
    %157 = arith.subf %156, %129 : vector<8x128xf32>
    %cst_49 = arith.constant 0.000000e+00 : f32
    %158 = vector.broadcast %cst_49 : f32 to vector<8x128xf32>
    %159 = arith.subf %158, %132 : vector<8x128xf32>
    %c1_i32_50 = arith.constant 1 : i32
    %160 = vector.broadcast %c1_i32_50 : i32 to vector<8x128xi32>
    %161 = arith.cmpi sge, %11, %160 : vector<8x128xi32>
    %162 = arith.extui %161 : vector<8x128xi1> to vector<8x128xi32>
    %163 = arith.sitofp %162 : vector<8x128xi32> to vector<8x128xf32>
    %c1_i32_51 = arith.constant 1 : i32
    %164 = tpu.dynamic_rotate %157 by %c1_i32_51 dim 1 : vector<8x128xf32>, i32 -> vector<8x128xf32>
    %cst_52 = arith.constant 1.000000e+00 : f32
    %165 = vector.broadcast %cst_52 : f32 to vector<8x128xf32>
    %166 = arith.select %161, %164, %165 : vector<8x128xi1>, vector<8x128xf32>
    %c1_i32_53 = arith.constant 1 : i32
    %167 = tpu.dynamic_rotate %159 by %c1_i32_53 dim 1 : vector<8x128xf32>, i32 -> vector<8x128xf32>
    %cst_54 = arith.constant 0.000000e+00 : f32
    %168 = vector.broadcast %cst_54 : f32 to vector<8x128xf32>
    %169 = arith.select %161, %167, %168 : vector<8x128xi1>, vector<8x128xf32>
    %c1_i32_55 = arith.constant 1 : i32
    %170 = tpu.dynamic_rotate %155 by %c1_i32_55 dim 1 : vector<8x128xf32>, i32 -> vector<8x128xf32>
    %cst_56 = arith.constant 0.000000e+00 : f32
    %171 = vector.broadcast %cst_56 : f32 to vector<8x128xf32>
    %172 = arith.select %161, %170, %171 : vector<8x128xi1>, vector<8x128xf32>
    %173 = arith.mulf %157, %166 : vector<8x128xf32>
    %174 = arith.mulf %159, %163 : vector<8x128xf32>
    %175 = arith.addf %173, %174 : vector<8x128xf32>
    %176 = arith.mulf %157, %169 : vector<8x128xf32>
    %cst_57 = arith.constant 1.000000e+00 : f32
    %177 = vector.broadcast %cst_57 : f32 to vector<8x128xf32>
    %178 = arith.subf %177, %163 : vector<8x128xf32>
    %179 = arith.mulf %159, %178 : vector<8x128xf32>
    %180 = arith.addf %176, %179 : vector<8x128xf32>
    %181 = arith.mulf %157, %172 : vector<8x128xf32>
    %182 = arith.addf %181, %155 : vector<8x128xf32>
    %c2_i32_58 = arith.constant 2 : i32
    %183 = vector.broadcast %c2_i32_58 : i32 to vector<8x128xi32>
    %184 = arith.cmpi sge, %11, %183 : vector<8x128xi32>
    %c2_i32_59 = arith.constant 2 : i32
    %185 = tpu.dynamic_rotate %175 by %c2_i32_59 dim 1 : vector<8x128xf32>, i32 -> vector<8x128xf32>
    %cst_60 = arith.constant 1.000000e+00 : f32
    %186 = vector.broadcast %cst_60 : f32 to vector<8x128xf32>
    %187 = arith.select %184, %185, %186 : vector<8x128xi1>, vector<8x128xf32>
    %c2_i32_61 = arith.constant 2 : i32
    %188 = tpu.dynamic_rotate %180 by %c2_i32_61 dim 1 : vector<8x128xf32>, i32 -> vector<8x128xf32>
    %cst_62 = arith.constant 0.000000e+00 : f32
    %189 = vector.broadcast %cst_62 : f32 to vector<8x128xf32>
    %190 = arith.select %184, %188, %189 : vector<8x128xi1>, vector<8x128xf32>
    %c2_i32_63 = arith.constant 2 : i32
    %191 = tpu.dynamic_rotate %166 by %c2_i32_63 dim 1 : vector<8x128xf32>, i32 -> vector<8x128xf32>
    %cst_64 = arith.constant 0.000000e+00 : f32
    %192 = vector.broadcast %cst_64 : f32 to vector<8x128xf32>
    %193 = arith.select %184, %191, %192 : vector<8x128xi1>, vector<8x128xf32>
    %c2_i32_65 = arith.constant 2 : i32
    %194 = tpu.dynamic_rotate %169 by %c2_i32_65 dim 1 : vector<8x128xf32>, i32 -> vector<8x128xf32>
    %cst_66 = arith.constant 1.000000e+00 : f32
    %195 = vector.broadcast %cst_66 : f32 to vector<8x128xf32>
    %196 = arith.select %184, %194, %195 : vector<8x128xi1>, vector<8x128xf32>
    %c2_i32_67 = arith.constant 2 : i32
    %197 = tpu.dynamic_rotate %182 by %c2_i32_67 dim 1 : vector<8x128xf32>, i32 -> vector<8x128xf32>
    %cst_68 = arith.constant 0.000000e+00 : f32
    %198 = vector.broadcast %cst_68 : f32 to vector<8x128xf32>
    %199 = arith.select %184, %197, %198 : vector<8x128xi1>, vector<8x128xf32>
    %c2_i32_69 = arith.constant 2 : i32
    %200 = tpu.dynamic_rotate %172 by %c2_i32_69 dim 1 : vector<8x128xf32>, i32 -> vector<8x128xf32>
    %cst_70 = arith.constant 0.000000e+00 : f32
    %201 = vector.broadcast %cst_70 : f32 to vector<8x128xf32>
    %202 = arith.select %184, %200, %201 : vector<8x128xi1>, vector<8x128xf32>
    %203 = arith.mulf %175, %187 : vector<8x128xf32>
    %204 = arith.mulf %180, %193 : vector<8x128xf32>
    %205 = arith.addf %203, %204 : vector<8x128xf32>
    %206 = arith.mulf %175, %190 : vector<8x128xf32>
    %207 = arith.mulf %180, %196 : vector<8x128xf32>
    %208 = arith.addf %206, %207 : vector<8x128xf32>
    %209 = arith.mulf %166, %187 : vector<8x128xf32>
    %210 = arith.mulf %169, %193 : vector<8x128xf32>
    %211 = arith.addf %209, %210 : vector<8x128xf32>
    %212 = arith.mulf %166, %190 : vector<8x128xf32>
    %213 = arith.mulf %169, %196 : vector<8x128xf32>
    %214 = arith.addf %212, %213 : vector<8x128xf32>
    %215 = arith.mulf %175, %199 : vector<8x128xf32>
    %216 = arith.mulf %180, %202 : vector<8x128xf32>
    %217 = arith.addf %215, %216 : vector<8x128xf32>
    %218 = arith.addf %217, %182 : vector<8x128xf32>
    %219 = arith.mulf %166, %199 : vector<8x128xf32>
    %220 = arith.mulf %169, %202 : vector<8x128xf32>
    %221 = arith.addf %219, %220 : vector<8x128xf32>
    %222 = arith.addf %221, %172 : vector<8x128xf32>
    %c4_i32 = arith.constant 4 : i32
    %223 = vector.broadcast %c4_i32 : i32 to vector<8x128xi32>
    %224 = arith.cmpi sge, %11, %223 : vector<8x128xi32>
    %c4_i32_71 = arith.constant 4 : i32
    %225 = tpu.dynamic_rotate %205 by %c4_i32_71 dim 1 : vector<8x128xf32>, i32 -> vector<8x128xf32>
    %cst_72 = arith.constant 1.000000e+00 : f32
    %226 = vector.broadcast %cst_72 : f32 to vector<8x128xf32>
    %227 = arith.select %224, %225, %226 : vector<8x128xi1>, vector<8x128xf32>
    %c4_i32_73 = arith.constant 4 : i32
    %228 = tpu.dynamic_rotate %208 by %c4_i32_73 dim 1 : vector<8x128xf32>, i32 -> vector<8x128xf32>
    %cst_74 = arith.constant 0.000000e+00 : f32
    %229 = vector.broadcast %cst_74 : f32 to vector<8x128xf32>
    %230 = arith.select %224, %228, %229 : vector<8x128xi1>, vector<8x128xf32>
    %c4_i32_75 = arith.constant 4 : i32
    %231 = tpu.dynamic_rotate %211 by %c4_i32_75 dim 1 : vector<8x128xf32>, i32 -> vector<8x128xf32>
    %cst_76 = arith.constant 0.000000e+00 : f32
    %232 = vector.broadcast %cst_76 : f32 to vector<8x128xf32>
    %233 = arith.select %224, %231, %232 : vector<8x128xi1>, vector<8x128xf32>
    %c4_i32_77 = arith.constant 4 : i32
    %234 = tpu.dynamic_rotate %214 by %c4_i32_77 dim 1 : vector<8x128xf32>, i32 -> vector<8x128xf32>
    %cst_78 = arith.constant 1.000000e+00 : f32
    %235 = vector.broadcast %cst_78 : f32 to vector<8x128xf32>
    %236 = arith.select %224, %234, %235 : vector<8x128xi1>, vector<8x128xf32>
    %c4_i32_79 = arith.constant 4 : i32
    %237 = tpu.dynamic_rotate %218 by %c4_i32_79 dim 1 : vector<8x128xf32>, i32 -> vector<8x128xf32>
    %cst_80 = arith.constant 0.000000e+00 : f32
    %238 = vector.broadcast %cst_80 : f32 to vector<8x128xf32>
    %239 = arith.select %224, %237, %238 : vector<8x128xi1>, vector<8x128xf32>
    %c4_i32_81 = arith.constant 4 : i32
    %240 = tpu.dynamic_rotate %222 by %c4_i32_81 dim 1 : vector<8x128xf32>, i32 -> vector<8x128xf32>
    %cst_82 = arith.constant 0.000000e+00 : f32
    %241 = vector.broadcast %cst_82 : f32 to vector<8x128xf32>
    %242 = arith.select %224, %240, %241 : vector<8x128xi1>, vector<8x128xf32>
    %243 = arith.mulf %205, %227 : vector<8x128xf32>
    %244 = arith.mulf %208, %233 : vector<8x128xf32>
    %245 = arith.addf %243, %244 : vector<8x128xf32>
    %246 = arith.mulf %205, %230 : vector<8x128xf32>
    %247 = arith.mulf %208, %236 : vector<8x128xf32>
    %248 = arith.addf %246, %247 : vector<8x128xf32>
    %249 = arith.mulf %211, %227 : vector<8x128xf32>
    %250 = arith.mulf %214, %233 : vector<8x128xf32>
    %251 = arith.addf %249, %250 : vector<8x128xf32>
    %252 = arith.mulf %211, %230 : vector<8x128xf32>
    %253 = arith.mulf %214, %236 : vector<8x128xf32>
    %254 = arith.addf %252, %253 : vector<8x128xf32>
    %255 = arith.mulf %205, %239 : vector<8x128xf32>
    %256 = arith.mulf %208, %242 : vector<8x128xf32>
    %257 = arith.addf %255, %256 : vector<8x128xf32>
    %258 = arith.addf %257, %218 : vector<8x128xf32>
    %259 = arith.mulf %211, %239 : vector<8x128xf32>
    %260 = arith.mulf %214, %242 : vector<8x128xf32>
    %261 = arith.addf %259, %260 : vector<8x128xf32>
    %262 = arith.addf %261, %222 : vector<8x128xf32>
    %c8_i32 = arith.constant 8 : i32
    %263 = vector.broadcast %c8_i32 : i32 to vector<8x128xi32>
    %264 = arith.cmpi sge, %11, %263 : vector<8x128xi32>
    %c8_i32_83 = arith.constant 8 : i32
    %265 = tpu.dynamic_rotate %245 by %c8_i32_83 dim 1 : vector<8x128xf32>, i32 -> vector<8x128xf32>
    %cst_84 = arith.constant 1.000000e+00 : f32
    %266 = vector.broadcast %cst_84 : f32 to vector<8x128xf32>
    %267 = arith.select %264, %265, %266 : vector<8x128xi1>, vector<8x128xf32>
    %c8_i32_85 = arith.constant 8 : i32
    %268 = tpu.dynamic_rotate %248 by %c8_i32_85 dim 1 : vector<8x128xf32>, i32 -> vector<8x128xf32>
    %cst_86 = arith.constant 0.000000e+00 : f32
    %269 = vector.broadcast %cst_86 : f32 to vector<8x128xf32>
    %270 = arith.select %264, %268, %269 : vector<8x128xi1>, vector<8x128xf32>
    %c8_i32_87 = arith.constant 8 : i32
    %271 = tpu.dynamic_rotate %251 by %c8_i32_87 dim 1 : vector<8x128xf32>, i32 -> vector<8x128xf32>
    %cst_88 = arith.constant 0.000000e+00 : f32
    %272 = vector.broadcast %cst_88 : f32 to vector<8x128xf32>
    %273 = arith.select %264, %271, %272 : vector<8x128xi1>, vector<8x128xf32>
    %c8_i32_89 = arith.constant 8 : i32
    %274 = tpu.dynamic_rotate %254 by %c8_i32_89 dim 1 : vector<8x128xf32>, i32 -> vector<8x128xf32>
    %cst_90 = arith.constant 1.000000e+00 : f32
    %275 = vector.broadcast %cst_90 : f32 to vector<8x128xf32>
    %276 = arith.select %264, %274, %275 : vector<8x128xi1>, vector<8x128xf32>
    %c8_i32_91 = arith.constant 8 : i32
    %277 = tpu.dynamic_rotate %258 by %c8_i32_91 dim 1 : vector<8x128xf32>, i32 -> vector<8x128xf32>
    %cst_92 = arith.constant 0.000000e+00 : f32
    %278 = vector.broadcast %cst_92 : f32 to vector<8x128xf32>
    %279 = arith.select %264, %277, %278 : vector<8x128xi1>, vector<8x128xf32>
    %c8_i32_93 = arith.constant 8 : i32
    %280 = tpu.dynamic_rotate %262 by %c8_i32_93 dim 1 : vector<8x128xf32>, i32 -> vector<8x128xf32>
    %cst_94 = arith.constant 0.000000e+00 : f32
    %281 = vector.broadcast %cst_94 : f32 to vector<8x128xf32>
    %282 = arith.select %264, %280, %281 : vector<8x128xi1>, vector<8x128xf32>
    %283 = arith.mulf %245, %267 : vector<8x128xf32>
    %284 = arith.mulf %248, %273 : vector<8x128xf32>
    %285 = arith.addf %283, %284 : vector<8x128xf32>
    %286 = arith.mulf %245, %270 : vector<8x128xf32>
    %287 = arith.mulf %248, %276 : vector<8x128xf32>
    %288 = arith.addf %286, %287 : vector<8x128xf32>
    %289 = arith.mulf %251, %267 : vector<8x128xf32>
    %290 = arith.mulf %254, %273 : vector<8x128xf32>
    %291 = arith.addf %289, %290 : vector<8x128xf32>
    %292 = arith.mulf %251, %270 : vector<8x128xf32>
    %293 = arith.mulf %254, %276 : vector<8x128xf32>
    %294 = arith.addf %292, %293 : vector<8x128xf32>
    %295 = arith.mulf %245, %279 : vector<8x128xf32>
    %296 = arith.mulf %248, %282 : vector<8x128xf32>
    %297 = arith.addf %295, %296 : vector<8x128xf32>
    %298 = arith.addf %297, %258 : vector<8x128xf32>
    %299 = arith.mulf %251, %279 : vector<8x128xf32>
    %300 = arith.mulf %254, %282 : vector<8x128xf32>
    %301 = arith.addf %299, %300 : vector<8x128xf32>
    %302 = arith.addf %301, %262 : vector<8x128xf32>
    %c16_i32 = arith.constant 16 : i32
    %303 = vector.broadcast %c16_i32 : i32 to vector<8x128xi32>
    %304 = arith.cmpi sge, %11, %303 : vector<8x128xi32>
    %c16_i32_95 = arith.constant 16 : i32
    %305 = tpu.dynamic_rotate %285 by %c16_i32_95 dim 1 : vector<8x128xf32>, i32 -> vector<8x128xf32>
    %cst_96 = arith.constant 1.000000e+00 : f32
    %306 = vector.broadcast %cst_96 : f32 to vector<8x128xf32>
    %307 = arith.select %304, %305, %306 : vector<8x128xi1>, vector<8x128xf32>
    %c16_i32_97 = arith.constant 16 : i32
    %308 = tpu.dynamic_rotate %288 by %c16_i32_97 dim 1 : vector<8x128xf32>, i32 -> vector<8x128xf32>
    %cst_98 = arith.constant 0.000000e+00 : f32
    %309 = vector.broadcast %cst_98 : f32 to vector<8x128xf32>
    %310 = arith.select %304, %308, %309 : vector<8x128xi1>, vector<8x128xf32>
    %c16_i32_99 = arith.constant 16 : i32
    %311 = tpu.dynamic_rotate %291 by %c16_i32_99 dim 1 : vector<8x128xf32>, i32 -> vector<8x128xf32>
    %cst_100 = arith.constant 0.000000e+00 : f32
    %312 = vector.broadcast %cst_100 : f32 to vector<8x128xf32>
    %313 = arith.select %304, %311, %312 : vector<8x128xi1>, vector<8x128xf32>
    %c16_i32_101 = arith.constant 16 : i32
    %314 = tpu.dynamic_rotate %294 by %c16_i32_101 dim 1 : vector<8x128xf32>, i32 -> vector<8x128xf32>
    %cst_102 = arith.constant 1.000000e+00 : f32
    %315 = vector.broadcast %cst_102 : f32 to vector<8x128xf32>
    %316 = arith.select %304, %314, %315 : vector<8x128xi1>, vector<8x128xf32>
    %c16_i32_103 = arith.constant 16 : i32
    %317 = tpu.dynamic_rotate %298 by %c16_i32_103 dim 1 : vector<8x128xf32>, i32 -> vector<8x128xf32>
    %cst_104 = arith.constant 0.000000e+00 : f32
    %318 = vector.broadcast %cst_104 : f32 to vector<8x128xf32>
    %319 = arith.select %304, %317, %318 : vector<8x128xi1>, vector<8x128xf32>
    %c16_i32_105 = arith.constant 16 : i32
    %320 = tpu.dynamic_rotate %302 by %c16_i32_105 dim 1 : vector<8x128xf32>, i32 -> vector<8x128xf32>
    %cst_106 = arith.constant 0.000000e+00 : f32
    %321 = vector.broadcast %cst_106 : f32 to vector<8x128xf32>
    %322 = arith.select %304, %320, %321 : vector<8x128xi1>, vector<8x128xf32>
    %323 = arith.mulf %285, %307 : vector<8x128xf32>
    %324 = arith.mulf %288, %313 : vector<8x128xf32>
    %325 = arith.addf %323, %324 : vector<8x128xf32>
    %326 = arith.mulf %285, %310 : vector<8x128xf32>
    %327 = arith.mulf %288, %316 : vector<8x128xf32>
    %328 = arith.addf %326, %327 : vector<8x128xf32>
    %329 = arith.mulf %291, %307 : vector<8x128xf32>
    %330 = arith.mulf %294, %313 : vector<8x128xf32>
    %331 = arith.addf %329, %330 : vector<8x128xf32>
    %332 = arith.mulf %291, %310 : vector<8x128xf32>
    %333 = arith.mulf %294, %316 : vector<8x128xf32>
    %334 = arith.addf %332, %333 : vector<8x128xf32>
    %335 = arith.mulf %285, %319 : vector<8x128xf32>
    %336 = arith.mulf %288, %322 : vector<8x128xf32>
    %337 = arith.addf %335, %336 : vector<8x128xf32>
    %338 = arith.addf %337, %298 : vector<8x128xf32>
    %339 = arith.mulf %291, %319 : vector<8x128xf32>
    %340 = arith.mulf %294, %322 : vector<8x128xf32>
    %341 = arith.addf %339, %340 : vector<8x128xf32>
    %342 = arith.addf %341, %302 : vector<8x128xf32>
    %c32_i32 = arith.constant 32 : i32
    %343 = vector.broadcast %c32_i32 : i32 to vector<8x128xi32>
    %344 = arith.cmpi sge, %11, %343 : vector<8x128xi32>
    %c32_i32_107 = arith.constant 32 : i32
    %345 = tpu.dynamic_rotate %325 by %c32_i32_107 dim 1 : vector<8x128xf32>, i32 -> vector<8x128xf32>
    %cst_108 = arith.constant 1.000000e+00 : f32
    %346 = vector.broadcast %cst_108 : f32 to vector<8x128xf32>
    %347 = arith.select %344, %345, %346 : vector<8x128xi1>, vector<8x128xf32>
    %c32_i32_109 = arith.constant 32 : i32
    %348 = tpu.dynamic_rotate %328 by %c32_i32_109 dim 1 : vector<8x128xf32>, i32 -> vector<8x128xf32>
    %cst_110 = arith.constant 0.000000e+00 : f32
    %349 = vector.broadcast %cst_110 : f32 to vector<8x128xf32>
    %350 = arith.select %344, %348, %349 : vector<8x128xi1>, vector<8x128xf32>
    %c32_i32_111 = arith.constant 32 : i32
    %351 = tpu.dynamic_rotate %331 by %c32_i32_111 dim 1 : vector<8x128xf32>, i32 -> vector<8x128xf32>
    %cst_112 = arith.constant 0.000000e+00 : f32
    %352 = vector.broadcast %cst_112 : f32 to vector<8x128xf32>
    %353 = arith.select %344, %351, %352 : vector<8x128xi1>, vector<8x128xf32>
    %c32_i32_113 = arith.constant 32 : i32
    %354 = tpu.dynamic_rotate %334 by %c32_i32_113 dim 1 : vector<8x128xf32>, i32 -> vector<8x128xf32>
    %cst_114 = arith.constant 1.000000e+00 : f32
    %355 = vector.broadcast %cst_114 : f32 to vector<8x128xf32>
    %356 = arith.select %344, %354, %355 : vector<8x128xi1>, vector<8x128xf32>
    %c32_i32_115 = arith.constant 32 : i32
    %357 = tpu.dynamic_rotate %338 by %c32_i32_115 dim 1 : vector<8x128xf32>, i32 -> vector<8x128xf32>
    %cst_116 = arith.constant 0.000000e+00 : f32
    %358 = vector.broadcast %cst_116 : f32 to vector<8x128xf32>
    %359 = arith.select %344, %357, %358 : vector<8x128xi1>, vector<8x128xf32>
    %c32_i32_117 = arith.constant 32 : i32
    %360 = tpu.dynamic_rotate %342 by %c32_i32_117 dim 1 : vector<8x128xf32>, i32 -> vector<8x128xf32>
    %cst_118 = arith.constant 0.000000e+00 : f32
    %361 = vector.broadcast %cst_118 : f32 to vector<8x128xf32>
    %362 = arith.select %344, %360, %361 : vector<8x128xi1>, vector<8x128xf32>
    %363 = arith.mulf %325, %347 : vector<8x128xf32>
    %364 = arith.mulf %328, %353 : vector<8x128xf32>
    %365 = arith.addf %363, %364 : vector<8x128xf32>
    %366 = arith.mulf %325, %350 : vector<8x128xf32>
    %367 = arith.mulf %328, %356 : vector<8x128xf32>
    %368 = arith.addf %366, %367 : vector<8x128xf32>
    %369 = arith.mulf %331, %347 : vector<8x128xf32>
    %370 = arith.mulf %334, %353 : vector<8x128xf32>
    %371 = arith.addf %369, %370 : vector<8x128xf32>
    %372 = arith.mulf %331, %350 : vector<8x128xf32>
    %373 = arith.mulf %334, %356 : vector<8x128xf32>
    %374 = arith.addf %372, %373 : vector<8x128xf32>
    %375 = arith.mulf %325, %359 : vector<8x128xf32>
    %376 = arith.mulf %328, %362 : vector<8x128xf32>
    %377 = arith.addf %375, %376 : vector<8x128xf32>
    %378 = arith.addf %377, %338 : vector<8x128xf32>
    %379 = arith.mulf %331, %359 : vector<8x128xf32>
    %380 = arith.mulf %334, %362 : vector<8x128xf32>
    %381 = arith.addf %379, %380 : vector<8x128xf32>
    %382 = arith.addf %381, %342 : vector<8x128xf32>
    %c64_i32 = arith.constant 64 : i32
    %383 = vector.broadcast %c64_i32 : i32 to vector<8x128xi32>
    %384 = arith.cmpi sge, %11, %383 : vector<8x128xi32>
    %c64_i32_119 = arith.constant 64 : i32
    %385 = tpu.dynamic_rotate %365 by %c64_i32_119 dim 1 : vector<8x128xf32>, i32 -> vector<8x128xf32>
    %cst_120 = arith.constant 1.000000e+00 : f32
    %386 = vector.broadcast %cst_120 : f32 to vector<8x128xf32>
    %387 = arith.select %384, %385, %386 : vector<8x128xi1>, vector<8x128xf32>
    %c64_i32_121 = arith.constant 64 : i32
    %388 = tpu.dynamic_rotate %368 by %c64_i32_121 dim 1 : vector<8x128xf32>, i32 -> vector<8x128xf32>
    %cst_122 = arith.constant 0.000000e+00 : f32
    %389 = vector.broadcast %cst_122 : f32 to vector<8x128xf32>
    %390 = arith.select %384, %388, %389 : vector<8x128xi1>, vector<8x128xf32>
    %c64_i32_123 = arith.constant 64 : i32
    %391 = tpu.dynamic_rotate %371 by %c64_i32_123 dim 1 : vector<8x128xf32>, i32 -> vector<8x128xf32>
    %cst_124 = arith.constant 0.000000e+00 : f32
    %392 = vector.broadcast %cst_124 : f32 to vector<8x128xf32>
    %393 = arith.select %384, %391, %392 : vector<8x128xi1>, vector<8x128xf32>
    %c64_i32_125 = arith.constant 64 : i32
    %394 = tpu.dynamic_rotate %374 by %c64_i32_125 dim 1 : vector<8x128xf32>, i32 -> vector<8x128xf32>
    %cst_126 = arith.constant 1.000000e+00 : f32
    %395 = vector.broadcast %cst_126 : f32 to vector<8x128xf32>
    %396 = arith.select %384, %394, %395 : vector<8x128xi1>, vector<8x128xf32>
    %c64_i32_127 = arith.constant 64 : i32
    %397 = tpu.dynamic_rotate %378 by %c64_i32_127 dim 1 : vector<8x128xf32>, i32 -> vector<8x128xf32>
    %cst_128 = arith.constant 0.000000e+00 : f32
    %398 = vector.broadcast %cst_128 : f32 to vector<8x128xf32>
    %399 = arith.select %384, %397, %398 : vector<8x128xi1>, vector<8x128xf32>
    %c64_i32_129 = arith.constant 64 : i32
    %400 = tpu.dynamic_rotate %382 by %c64_i32_129 dim 1 : vector<8x128xf32>, i32 -> vector<8x128xf32>
    %cst_130 = arith.constant 0.000000e+00 : f32
    %401 = vector.broadcast %cst_130 : f32 to vector<8x128xf32>
    %402 = arith.select %384, %400, %401 : vector<8x128xi1>, vector<8x128xf32>
    %403 = arith.mulf %365, %387 : vector<8x128xf32>
    %404 = arith.mulf %368, %393 : vector<8x128xf32>
    %405 = arith.addf %403, %404 : vector<8x128xf32>
    %406 = arith.mulf %365, %390 : vector<8x128xf32>
    %407 = arith.mulf %368, %396 : vector<8x128xf32>
    %408 = arith.addf %406, %407 : vector<8x128xf32>
    %409 = arith.mulf %371, %387 : vector<8x128xf32>
    %410 = arith.mulf %374, %393 : vector<8x128xf32>
    %411 = arith.addf %409, %410 : vector<8x128xf32>
    %412 = arith.mulf %371, %390 : vector<8x128xf32>
    %413 = arith.mulf %374, %396 : vector<8x128xf32>
    %414 = arith.addf %412, %413 : vector<8x128xf32>
    %415 = arith.mulf %365, %399 : vector<8x128xf32>
    %416 = arith.mulf %368, %402 : vector<8x128xf32>
    %417 = arith.addf %415, %416 : vector<8x128xf32>
    %418 = arith.addf %417, %378 : vector<8x128xf32>
    %419 = arith.mulf %371, %399 : vector<8x128xf32>
    %420 = arith.mulf %374, %402 : vector<8x128xf32>
    %421 = arith.addf %419, %420 : vector<8x128xf32>
    %422 = arith.addf %421, %382 : vector<8x128xf32>
    %c127_i32 = arith.constant 127 : i32
    %423 = vector.broadcast %c127_i32 : i32 to vector<8x128xi32>
    %424 = arith.cmpi eq, %11, %423 : vector<8x128xi32>
    %cst_131 = arith.constant 0.000000e+00 : f32
    %425 = vector.broadcast %cst_131 : f32 to vector<8x128xf32>
    %426 = arith.select %424, %405, %425 : vector<8x128xi1>, vector<8x128xf32>
    %cst_132 = arith.constant dense<0.000000e+00> : vector<8xf32>
    %427 = vector.multi_reduction <add>, %426, %cst_132 [1] : vector<8x128xf32> to vector<8xf32>
    %428 = vector.shape_cast %427 : vector<8xf32> to vector<8x1xf32>
    %429 = vector.shape_cast %428 : vector<8x1xf32> to vector<8x1xf32>
    %430 = vector.broadcast %429 : vector<8x1xf32> to vector<8x128xf32>
    %c127_i32_133 = arith.constant 127 : i32
    %431 = vector.broadcast %c127_i32_133 : i32 to vector<8x128xi32>
    %432 = arith.cmpi eq, %11, %431 : vector<8x128xi32>
    %cst_134 = arith.constant 0.000000e+00 : f32
    %433 = vector.broadcast %cst_134 : f32 to vector<8x128xf32>
    %434 = arith.select %432, %408, %433 : vector<8x128xi1>, vector<8x128xf32>
    %cst_135 = arith.constant dense<0.000000e+00> : vector<8xf32>
    %435 = vector.multi_reduction <add>, %434, %cst_135 [1] : vector<8x128xf32> to vector<8xf32>
    %436 = vector.shape_cast %435 : vector<8xf32> to vector<8x1xf32>
    %437 = vector.shape_cast %436 : vector<8x1xf32> to vector<8x1xf32>
    %438 = vector.broadcast %437 : vector<8x1xf32> to vector<8x128xf32>
    %c127_i32_136 = arith.constant 127 : i32
    %439 = vector.broadcast %c127_i32_136 : i32 to vector<8x128xi32>
    %440 = arith.cmpi eq, %11, %439 : vector<8x128xi32>
    %cst_137 = arith.constant 0.000000e+00 : f32
    %441 = vector.broadcast %cst_137 : f32 to vector<8x128xf32>
    %442 = arith.select %440, %411, %441 : vector<8x128xi1>, vector<8x128xf32>
    %cst_138 = arith.constant dense<0.000000e+00> : vector<8xf32>
    %443 = vector.multi_reduction <add>, %442, %cst_138 [1] : vector<8x128xf32> to vector<8xf32>
    %444 = vector.shape_cast %443 : vector<8xf32> to vector<8x1xf32>
    %445 = vector.shape_cast %444 : vector<8x1xf32> to vector<8x1xf32>
    %446 = vector.broadcast %445 : vector<8x1xf32> to vector<8x128xf32>
    %c127_i32_139 = arith.constant 127 : i32
    %447 = vector.broadcast %c127_i32_139 : i32 to vector<8x128xi32>
    %448 = arith.cmpi eq, %11, %447 : vector<8x128xi32>
    %cst_140 = arith.constant 0.000000e+00 : f32
    %449 = vector.broadcast %cst_140 : f32 to vector<8x128xf32>
    %450 = arith.select %448, %414, %449 : vector<8x128xi1>, vector<8x128xf32>
    %cst_141 = arith.constant dense<0.000000e+00> : vector<8xf32>
    %451 = vector.multi_reduction <add>, %450, %cst_141 [1] : vector<8x128xf32> to vector<8xf32>
    %452 = vector.shape_cast %451 : vector<8xf32> to vector<8x1xf32>
    %453 = vector.shape_cast %452 : vector<8x1xf32> to vector<8x1xf32>
    %454 = vector.broadcast %453 : vector<8x1xf32> to vector<8x128xf32>
    %c127_i32_142 = arith.constant 127 : i32
    %455 = vector.broadcast %c127_i32_142 : i32 to vector<8x128xi32>
    %456 = arith.cmpi eq, %11, %455 : vector<8x128xi32>
    %cst_143 = arith.constant 0.000000e+00 : f32
    %457 = vector.broadcast %cst_143 : f32 to vector<8x128xf32>
    %458 = arith.select %456, %418, %457 : vector<8x128xi1>, vector<8x128xf32>
    %cst_144 = arith.constant dense<0.000000e+00> : vector<8xf32>
    %459 = vector.multi_reduction <add>, %458, %cst_144 [1] : vector<8x128xf32> to vector<8xf32>
    %460 = vector.shape_cast %459 : vector<8xf32> to vector<8x1xf32>
    %461 = vector.shape_cast %460 : vector<8x1xf32> to vector<8x1xf32>
    %462 = vector.broadcast %461 : vector<8x1xf32> to vector<8x128xf32>
    %c127_i32_145 = arith.constant 127 : i32
    %463 = vector.broadcast %c127_i32_145 : i32 to vector<8x128xi32>
    %464 = arith.cmpi eq, %11, %463 : vector<8x128xi32>
    %cst_146 = arith.constant 0.000000e+00 : f32
    %465 = vector.broadcast %cst_146 : f32 to vector<8x128xf32>
    %466 = arith.select %464, %422, %465 : vector<8x128xi1>, vector<8x128xf32>
    %cst_147 = arith.constant dense<0.000000e+00> : vector<8xf32>
    %467 = vector.multi_reduction <add>, %466, %cst_147 [1] : vector<8x128xf32> to vector<8xf32>
    %468 = vector.shape_cast %467 : vector<8xf32> to vector<8x1xf32>
    %469 = vector.shape_cast %468 : vector<8x1xf32> to vector<8x1xf32>
    %470 = vector.broadcast %469 : vector<8x1xf32> to vector<8x128xf32>
    %c1_i32_148 = arith.constant 1 : i32
    %471 = vector.broadcast %c1_i32_148 : i32 to vector<8x128xi32>
    %472 = arith.cmpi sge, %12, %471 : vector<8x128xi32>
    %c1_i32_149 = arith.constant 1 : i32
    %473 = tpu.dynamic_rotate %430 by %c1_i32_149 dim 0 : vector<8x128xf32>, i32 -> vector<8x128xf32>
    %cst_150 = arith.constant 1.000000e+00 : f32
    %474 = vector.broadcast %cst_150 : f32 to vector<8x128xf32>
    %475 = arith.select %472, %473, %474 : vector<8x128xi1>, vector<8x128xf32>
    %c1_i32_151 = arith.constant 1 : i32
    %476 = tpu.dynamic_rotate %438 by %c1_i32_151 dim 0 : vector<8x128xf32>, i32 -> vector<8x128xf32>
    %cst_152 = arith.constant 0.000000e+00 : f32
    %477 = vector.broadcast %cst_152 : f32 to vector<8x128xf32>
    %478 = arith.select %472, %476, %477 : vector<8x128xi1>, vector<8x128xf32>
    %c1_i32_153 = arith.constant 1 : i32
    %479 = tpu.dynamic_rotate %446 by %c1_i32_153 dim 0 : vector<8x128xf32>, i32 -> vector<8x128xf32>
    %cst_154 = arith.constant 0.000000e+00 : f32
    %480 = vector.broadcast %cst_154 : f32 to vector<8x128xf32>
    %481 = arith.select %472, %479, %480 : vector<8x128xi1>, vector<8x128xf32>
    %c1_i32_155 = arith.constant 1 : i32
    %482 = tpu.dynamic_rotate %454 by %c1_i32_155 dim 0 : vector<8x128xf32>, i32 -> vector<8x128xf32>
    %cst_156 = arith.constant 1.000000e+00 : f32
    %483 = vector.broadcast %cst_156 : f32 to vector<8x128xf32>
    %484 = arith.select %472, %482, %483 : vector<8x128xi1>, vector<8x128xf32>
    %c1_i32_157 = arith.constant 1 : i32
    %485 = tpu.dynamic_rotate %462 by %c1_i32_157 dim 0 : vector<8x128xf32>, i32 -> vector<8x128xf32>
    %cst_158 = arith.constant 0.000000e+00 : f32
    %486 = vector.broadcast %cst_158 : f32 to vector<8x128xf32>
    %487 = arith.select %472, %485, %486 : vector<8x128xi1>, vector<8x128xf32>
    %c1_i32_159 = arith.constant 1 : i32
    %488 = tpu.dynamic_rotate %470 by %c1_i32_159 dim 0 : vector<8x128xf32>, i32 -> vector<8x128xf32>
    %cst_160 = arith.constant 0.000000e+00 : f32
    %489 = vector.broadcast %cst_160 : f32 to vector<8x128xf32>
    %490 = arith.select %472, %488, %489 : vector<8x128xi1>, vector<8x128xf32>
    %491 = arith.mulf %430, %475 : vector<8x128xf32>
    %492 = arith.mulf %438, %481 : vector<8x128xf32>
    %493 = arith.addf %491, %492 : vector<8x128xf32>
    %494 = arith.mulf %430, %478 : vector<8x128xf32>
    %495 = arith.mulf %438, %484 : vector<8x128xf32>
    %496 = arith.addf %494, %495 : vector<8x128xf32>
    %497 = arith.mulf %446, %475 : vector<8x128xf32>
    %498 = arith.mulf %454, %481 : vector<8x128xf32>
    %499 = arith.addf %497, %498 : vector<8x128xf32>
    %500 = arith.mulf %446, %478 : vector<8x128xf32>
    %501 = arith.mulf %454, %484 : vector<8x128xf32>
    %502 = arith.addf %500, %501 : vector<8x128xf32>
    %503 = arith.mulf %430, %487 : vector<8x128xf32>
    %504 = arith.mulf %438, %490 : vector<8x128xf32>
    %505 = arith.addf %503, %504 : vector<8x128xf32>
    %506 = arith.addf %505, %462 : vector<8x128xf32>
    %507 = arith.mulf %446, %487 : vector<8x128xf32>
    %508 = arith.mulf %454, %490 : vector<8x128xf32>
    %509 = arith.addf %507, %508 : vector<8x128xf32>
    %510 = arith.addf %509, %470 : vector<8x128xf32>
    %c2_i32_161 = arith.constant 2 : i32
    %511 = vector.broadcast %c2_i32_161 : i32 to vector<8x128xi32>
    %512 = arith.cmpi sge, %12, %511 : vector<8x128xi32>
    %c2_i32_162 = arith.constant 2 : i32
    %513 = tpu.dynamic_rotate %493 by %c2_i32_162 dim 0 : vector<8x128xf32>, i32 -> vector<8x128xf32>
    %cst_163 = arith.constant 1.000000e+00 : f32
    %514 = vector.broadcast %cst_163 : f32 to vector<8x128xf32>
    %515 = arith.select %512, %513, %514 : vector<8x128xi1>, vector<8x128xf32>
    %c2_i32_164 = arith.constant 2 : i32
    %516 = tpu.dynamic_rotate %496 by %c2_i32_164 dim 0 : vector<8x128xf32>, i32 -> vector<8x128xf32>
    %cst_165 = arith.constant 0.000000e+00 : f32
    %517 = vector.broadcast %cst_165 : f32 to vector<8x128xf32>
    %518 = arith.select %512, %516, %517 : vector<8x128xi1>, vector<8x128xf32>
    %c2_i32_166 = arith.constant 2 : i32
    %519 = tpu.dynamic_rotate %499 by %c2_i32_166 dim 0 : vector<8x128xf32>, i32 -> vector<8x128xf32>
    %cst_167 = arith.constant 0.000000e+00 : f32
    %520 = vector.broadcast %cst_167 : f32 to vector<8x128xf32>
    %521 = arith.select %512, %519, %520 : vector<8x128xi1>, vector<8x128xf32>
    %c2_i32_168 = arith.constant 2 : i32
    %522 = tpu.dynamic_rotate %502 by %c2_i32_168 dim 0 : vector<8x128xf32>, i32 -> vector<8x128xf32>
    %cst_169 = arith.constant 1.000000e+00 : f32
    %523 = vector.broadcast %cst_169 : f32 to vector<8x128xf32>
    %524 = arith.select %512, %522, %523 : vector<8x128xi1>, vector<8x128xf32>
    %c2_i32_170 = arith.constant 2 : i32
    %525 = tpu.dynamic_rotate %506 by %c2_i32_170 dim 0 : vector<8x128xf32>, i32 -> vector<8x128xf32>
    %cst_171 = arith.constant 0.000000e+00 : f32
    %526 = vector.broadcast %cst_171 : f32 to vector<8x128xf32>
    %527 = arith.select %512, %525, %526 : vector<8x128xi1>, vector<8x128xf32>
    %c2_i32_172 = arith.constant 2 : i32
    %528 = tpu.dynamic_rotate %510 by %c2_i32_172 dim 0 : vector<8x128xf32>, i32 -> vector<8x128xf32>
    %cst_173 = arith.constant 0.000000e+00 : f32
    %529 = vector.broadcast %cst_173 : f32 to vector<8x128xf32>
    %530 = arith.select %512, %528, %529 : vector<8x128xi1>, vector<8x128xf32>
    %531 = arith.mulf %493, %515 : vector<8x128xf32>
    %532 = arith.mulf %496, %521 : vector<8x128xf32>
    %533 = arith.addf %531, %532 : vector<8x128xf32>
    %534 = arith.mulf %493, %518 : vector<8x128xf32>
    %535 = arith.mulf %496, %524 : vector<8x128xf32>
    %536 = arith.addf %534, %535 : vector<8x128xf32>
    %537 = arith.mulf %499, %515 : vector<8x128xf32>
    %538 = arith.mulf %502, %521 : vector<8x128xf32>
    %539 = arith.addf %537, %538 : vector<8x128xf32>
    %540 = arith.mulf %499, %518 : vector<8x128xf32>
    %541 = arith.mulf %502, %524 : vector<8x128xf32>
    %542 = arith.addf %540, %541 : vector<8x128xf32>
    %543 = arith.mulf %493, %527 : vector<8x128xf32>
    %544 = arith.mulf %496, %530 : vector<8x128xf32>
    %545 = arith.addf %543, %544 : vector<8x128xf32>
    %546 = arith.addf %545, %506 : vector<8x128xf32>
    %547 = arith.mulf %499, %527 : vector<8x128xf32>
    %548 = arith.mulf %502, %530 : vector<8x128xf32>
    %549 = arith.addf %547, %548 : vector<8x128xf32>
    %550 = arith.addf %549, %510 : vector<8x128xf32>
    %c4_i32_174 = arith.constant 4 : i32
    %551 = vector.broadcast %c4_i32_174 : i32 to vector<8x128xi32>
    %552 = arith.cmpi sge, %12, %551 : vector<8x128xi32>
    %c4_i32_175 = arith.constant 4 : i32
    %553 = tpu.dynamic_rotate %533 by %c4_i32_175 dim 0 : vector<8x128xf32>, i32 -> vector<8x128xf32>
    %cst_176 = arith.constant 1.000000e+00 : f32
    %554 = vector.broadcast %cst_176 : f32 to vector<8x128xf32>
    %555 = arith.select %552, %553, %554 : vector<8x128xi1>, vector<8x128xf32>
    %c4_i32_177 = arith.constant 4 : i32
    %556 = tpu.dynamic_rotate %536 by %c4_i32_177 dim 0 : vector<8x128xf32>, i32 -> vector<8x128xf32>
    %cst_178 = arith.constant 0.000000e+00 : f32
    %557 = vector.broadcast %cst_178 : f32 to vector<8x128xf32>
    %558 = arith.select %552, %556, %557 : vector<8x128xi1>, vector<8x128xf32>
    %c4_i32_179 = arith.constant 4 : i32
    %559 = tpu.dynamic_rotate %539 by %c4_i32_179 dim 0 : vector<8x128xf32>, i32 -> vector<8x128xf32>
    %cst_180 = arith.constant 0.000000e+00 : f32
    %560 = vector.broadcast %cst_180 : f32 to vector<8x128xf32>
    %561 = arith.select %552, %559, %560 : vector<8x128xi1>, vector<8x128xf32>
    %c4_i32_181 = arith.constant 4 : i32
    %562 = tpu.dynamic_rotate %542 by %c4_i32_181 dim 0 : vector<8x128xf32>, i32 -> vector<8x128xf32>
    %cst_182 = arith.constant 1.000000e+00 : f32
    %563 = vector.broadcast %cst_182 : f32 to vector<8x128xf32>
    %564 = arith.select %552, %562, %563 : vector<8x128xi1>, vector<8x128xf32>
    %c4_i32_183 = arith.constant 4 : i32
    %565 = tpu.dynamic_rotate %546 by %c4_i32_183 dim 0 : vector<8x128xf32>, i32 -> vector<8x128xf32>
    %cst_184 = arith.constant 0.000000e+00 : f32
    %566 = vector.broadcast %cst_184 : f32 to vector<8x128xf32>
    %567 = arith.select %552, %565, %566 : vector<8x128xi1>, vector<8x128xf32>
    %c4_i32_185 = arith.constant 4 : i32
    %568 = tpu.dynamic_rotate %550 by %c4_i32_185 dim 0 : vector<8x128xf32>, i32 -> vector<8x128xf32>
    %cst_186 = arith.constant 0.000000e+00 : f32
    %569 = vector.broadcast %cst_186 : f32 to vector<8x128xf32>
    %570 = arith.select %552, %568, %569 : vector<8x128xi1>, vector<8x128xf32>
    %571 = arith.mulf %533, %555 : vector<8x128xf32>
    %572 = arith.mulf %536, %561 : vector<8x128xf32>
    %573 = arith.addf %571, %572 : vector<8x128xf32>
    %574 = arith.mulf %533, %558 : vector<8x128xf32>
    %575 = arith.mulf %536, %564 : vector<8x128xf32>
    %576 = arith.addf %574, %575 : vector<8x128xf32>
    %577 = arith.mulf %539, %555 : vector<8x128xf32>
    %578 = arith.mulf %542, %561 : vector<8x128xf32>
    %579 = arith.addf %577, %578 : vector<8x128xf32>
    %580 = arith.mulf %539, %558 : vector<8x128xf32>
    %581 = arith.mulf %542, %564 : vector<8x128xf32>
    %582 = arith.addf %580, %581 : vector<8x128xf32>
    %583 = arith.mulf %533, %567 : vector<8x128xf32>
    %584 = arith.mulf %536, %570 : vector<8x128xf32>
    %585 = arith.addf %583, %584 : vector<8x128xf32>
    %586 = arith.addf %585, %546 : vector<8x128xf32>
    %587 = arith.mulf %539, %567 : vector<8x128xf32>
    %588 = arith.mulf %542, %570 : vector<8x128xf32>
    %589 = arith.addf %587, %588 : vector<8x128xf32>
    %590 = arith.addf %589, %550 : vector<8x128xf32>
    %591 = vector.broadcast %6 : f32 to vector<8x128xf32>
    %592 = arith.mulf %573, %591 : vector<8x128xf32>
    %593 = vector.broadcast %5 : f32 to vector<8x128xf32>
    %594 = arith.mulf %576, %593 : vector<8x128xf32>
    %595 = arith.addf %592, %594 : vector<8x128xf32>
    %596 = arith.addf %595, %586 : vector<8x128xf32>
    %597 = vector.broadcast %6 : f32 to vector<8x128xf32>
    %598 = arith.mulf %579, %597 : vector<8x128xf32>
    %599 = vector.broadcast %5 : f32 to vector<8x128xf32>
    %600 = arith.mulf %582, %599 : vector<8x128xf32>
    %601 = arith.addf %598, %600 : vector<8x128xf32>
    %602 = arith.addf %601, %590 : vector<8x128xf32>
    %c1_i32_187 = arith.constant 1 : i32
    %603 = vector.broadcast %c1_i32_187 : i32 to vector<8x128xi32>
    %604 = arith.cmpi sge, %12, %603 : vector<8x128xi32>
    %c1_i32_188 = arith.constant 1 : i32
    %605 = tpu.dynamic_rotate %596 by %c1_i32_188 dim 0 : vector<8x128xf32>, i32 -> vector<8x128xf32>
    %606 = vector.broadcast %6 : f32 to vector<8x128xf32>
    %607 = arith.select %604, %605, %606 : vector<8x128xi1>, vector<8x128xf32>
    %c1_i32_189 = arith.constant 1 : i32
    %608 = tpu.dynamic_rotate %602 by %c1_i32_189 dim 0 : vector<8x128xf32>, i32 -> vector<8x128xf32>
    %609 = vector.broadcast %5 : f32 to vector<8x128xf32>
    %610 = arith.select %604, %608, %609 : vector<8x128xi1>, vector<8x128xf32>
    %611 = arith.mulf %405, %607 : vector<8x128xf32>
    %612 = arith.mulf %408, %610 : vector<8x128xf32>
    %613 = arith.addf %611, %612 : vector<8x128xf32>
    %614 = arith.addf %613, %418 : vector<8x128xf32>
    %615 = vector.broadcast %4 : f32 to vector<8x128xf32>
    %616 = arith.mulf %615, %614 : vector<8x128xf32>
    %617 = math.tanh %616 : vector<8x128xf32>
    %c0_190 = arith.constant 0 : index
    %c0_191 = arith.constant 0 : index
    %618 = vector.load %arg4[%c0_190, %c0_191] : memref<8x128xf32, #tpu.memory_space<vmem>>, vector<8x128xf32>
    tpu.vector_store %arg4[%c0_190, %c0_191], %617 {strides = array<i32>} : memref<8x128xf32, #tpu.memory_space<vmem>>, vector<8x128xf32>,
    %c7_i32 = arith.constant 7 : i32
    %619 = vector.broadcast %c7_i32 : i32 to vector<8x128xi32>
    %620 = arith.cmpi eq, %12, %619 : vector<8x128xi32>
    %cst_192 = arith.constant 0.000000e+00 : f32
    %621 = vector.broadcast %cst_192 : f32 to vector<8x128xf32>
    %622 = arith.select %620, %614, %621 : vector<8x128xi1>, vector<8x128xf32>
    %cst_193 = arith.constant dense<0.000000e+00> : vector<128xf32>
    %623 = vector.multi_reduction <add>, %622, %cst_193 [0] : vector<8x128xf32> to vector<128xf32>
    %624 = vector.shape_cast %623 : vector<128xf32> to vector<1x128xf32>
    %c7_i32_194 = arith.constant 7 : i32
    %625 = vector.broadcast %c7_i32_194 : i32 to vector<8x128xi32>
    %626 = arith.cmpi eq, %12, %625 : vector<8x128xi32>
    %cst_195 = arith.constant 0.000000e+00 : f32
    %627 = vector.broadcast %cst_195 : f32 to vector<8x128xf32>
    %628 = arith.select %626, %62, %627 : vector<8x128xi1>, vector<8x128xf32>
    %cst_196 = arith.constant dense<0.000000e+00> : vector<128xf32>
    %629 = vector.multi_reduction <add>, %628, %cst_196 [0] : vector<8x128xf32> to vector<128xf32>
    %630 = vector.shape_cast %629 : vector<128xf32> to vector<1x128xf32>
    %631 = tpu.concatenate %624, %630 in 0 : vector<1x128xf32>, vector<1x128xf32> -> vector<2x128xf32>
    %c0_197 = arith.constant 0 : index
    %c0_198 = arith.constant 0 : index
    %632 = vector.load %arg5[%c0_197, %c0_198] : memref<2x128xf32, #tpu.memory_space<vmem>>, vector<2x128xf32>
    tpu.vector_store %arg5[%c0_197, %c0_198], %631 {strides = array<i32>} : memref<2x128xf32, #tpu.memory_space<vmem>>, vector<2x128xf32>,
    return
  }
}

</mosaic_0001>

<bundles_post_ra>
// kernel: acid_forward.1
= control target key start
LH: loop header
LB: loop body
LE: loop exit
PB: predicated region body
PF: predicated region fallthrough
CT: control target
= control target key end

     0   :  { %11 = vsyncpa [#allocation4], 0  ;;  %s1500_s0 = inlined_call_operand.vmem [shape: f32[11], index: 0, kind: input, shape index: {}]   ;;  %s1501_s1 = inlined_call_operand.vmem [shape: f32[8,128], index: 1, kind: input, shape index: {}]   ;;  %s1502_s2 = inlined_call_operand.vmem [shape: f32[8,128], index: 2, kind: input, shape index: {}]   ;;  %s1503_s3 = inlined_call_operand.vmem [shape: f32[8,128], index: 3, kind: input, shape index: {}]   ;;  %s1504_s4 = inlined_call_operand.hbm [shape: f32[8,128], index: 4, kind: output, shape index: {0}]   ;;  %s1505_s5 = inlined_call_operand.vmem [shape: f32[2,128], index: 5, kind: output, shape index: {1}]  }
   0x1   :  { %12 = vsyncpa [#allocation3], 0  ;;  %s19_s20 = sshll.u32 %s1500_s0, 4  ;;  %s20_s20 = int_to_ptr.vmem [resolvable:$true] %s19_s20 }
   0x2   :  { %s1073_s21 = scalar_lea.vmem %s20_s20, 16  ;;  %p1078_p1 = scmp.lt.s32.totalorder %s20_s20, %s20_s20 }
   0x3   :  { %p1074_p0 = scmp.ne.s32.totalorder %s20_s20, %s1073_s21  ;;  %p1079_p2 = scmp.lt.s32.totalorder %s1073_s21, %s1073_s21 }
   0x5   :  { %p1080_p3 = por %p1079_p2, %p1078_p1 }
   0x7   :  { %p1081_p4 = pnand %p1080_p3, %p1074_p0 }
   0x9   :  { %1084 = shalt.err (!%p1081_p4)
}
   0xa   :  { %s1111_s22 = smov [#allocation2]  }
   0xb   :  { %22 = dma.vmem_to_smem %s20_s20, 16, %s1111_s22, [#allocation4]  }
   0xc   :  { %1107 = dma.done.wait [#allocation4], 16  }
   0xd   :  { %1108 = vsyncadd [#allocation4], 4294967280 }
   0xe   :  { %32 = sfence }
   0xf   :  { %v44_v0 = vlaneseq  ;;  %v323_v1 = vld [vmem:[%s1502_s2] sm:$0xff]  ;;  %s1002_s25 = sld [smem:[#allocation2 + $0x1]]  ;;  %s33_s0 = sld [smem:[#allocation2]]  ;;  %v1112_v29 = vmov 683565275  }
  0x10   :  { %v324_v2 = vmul.f32 7900.0, %v323_v1  ;;  %v51_v7 = vld [vmem:[%s1501_s1] sm:$0xff]  ;;  %v1113_v31 = vmov 2475754826   ;;  %v1114_v33 = vmov 2131351028  }
  0x11   :  { %v1163_v3 = vand.u32 127, %v44_v0  ;;  %v1165_v4 = vshrl.u32 %v44_v0, 7  ;;  %vm52_vm0 = vcmp.ne.f32.partialorder %v51_v7, 0.0  ;;  %v1115_v36 = vmov 2102212464   ;;  %s1010_s28 = sld [smem:[#allocation2 + $0x9]] }
  0x12   :  { %v325_v5 = vadd.f32 100.0, %v324_v2  ;;  %v1116_v38 = vmov 920167782   ;;  %v1117_v46 = vmov 1326507024   ;;  %s1011_s29 = sld [smem:[#allocation2 + $0xa]] }
  0x13   :  { %v48_v6 = vmul.u32 128, %v1165_v4  ;;  %s1003_s30 = sld [smem:[#allocation2 + $0x2]]  ;;  %s1008_s6 = sld [smem:[#allocation2 + $0x7]] }
  0x14   :  { %v1174_v9 = vmul.f32 0.00013089969, %v325_v5  ;;  %s1004_s9 = sld [smem:[#allocation2 + $0x3]]  ;;  %s1118_s10 = smov 2  }
  0x15   :  { %v1172_v8 = vadd.s32 %v48_v6, %v1163_v3  ;;  %v95_v11 = vstv %s1002_s25  ;;  %v97_v15 = vstv %s33_s0  ;;  %s1119_s11 = smov 1   ;;  %s1121_s12 = smov 4  }
  0x16   :  { %v333_v12 = vand.u32 2139095040, %v1174_v9  ;;  %v330_v22 = vand.u32 2147483647, %v1174_v9  ;;  %vm332_vm13 = vcmp.lt.s32.totalorder %v1174_v9, 0  ;;  %s1122_s13 = smov 8   ;;  %s1123_s14 = smov 16  }
  0x17   :  { %v1177_v10 = vcvt.s32.f32 %v1172_v8  ;;  %s1124_s15 = smov 32   ;;  %s1125_s16 = smov 64  }
  0x18   :  { %v334_v16 = vshrl.u32 %v333_v12, 23  ;;  %v337_v26 = vand.u32 8388607, %v330_v22  ;;  %vm331_vm14 = vcmp.le.f32.partialorder %v330_v22, 0.7853982  ;;  %s1446_s17 = sld [smem:[#allocation2 + $0x6]] }
  0x19   :  { %v53_v13 = vsel %vm52_vm0, %v1177_v10, 1024.0  ;;  %v94_v14 = vadd.f32 1.0, %v1177_v10  ;;  %s209_s7 = smul.f32 0.5, %s1003_s30  ;;  %s1006_s18 = sld [smem:[#allocation2 + $0x5]] }
  0x1a   :  { %54 = vmin.xlane.f32.xlu0 %v53_v13  ;;  %v1020_v18 = vadd.s32 4294967169, %v334_v16  ;;  %v338_v44 = vor.u32 8388608, %v337_v26  ;;  %s1005_s19 = sld [smem:[#allocation2 + $0x4]]  ;;  %s1126_s20 = smov [#allocation5]  }
  0x1b   :  { %v96_v17 = vmul.f32 %v95_v11, %v94_v14  ;;  %s210_s8 = ssub.f32 1.0, %s209_s7  ;;  %s989_s21 = sshll.u32 %s1126_s20, 4  ;;  %s990_s21 = int_to_ptr.vmem [resolvable:$true] %s989_s21 }
  0x1c   :  { %v340_v20 = vadd.s32 1, %v1020_v18  ;;  %v378_v57 = vshll.u32 %v338_v44, 8  ;;  %s1085_s24 = scalar_lea.vmem %s990_s21, 128  ;;  %p1090_p6 = scmp.lt.s32.totalorder %s990_s21, %s990_s21 }
  0x1d   :  { %v98_v19 = vadd.f32 %v97_v15, %v96_v17  ;;  %p1086_p5 = scmp.ne.s32.totalorder %s990_s21, %s1085_s24  ;;  %p1091_p7 = scmp.lt.s32.totalorder %s1085_s24, %s1085_s24 }
  0x1e   :  { %vm341_vm1 = vcmp.gt.s32.totalorder %v340_v20, 0 }
  0x1f   :  { %v99_v21 = vfloor.f32 %v98_v19  ;;  %v342_v24 = vsel %vm341_vm1, %v340_v20, 0  ;;  %p1092_p8 = por %p1091_p7, %p1090_p6 }
  0x20   :  { %v344_v25 = vand.u32 31, %v342_v24  ;;  %v343_v27 = vshrl.u32 %v342_v24, 5 }
  0x21   :  { %v100_v23 = vsub.f32 %v98_v19, %v99_v21  ;;  %p1093_p9 = pnand %p1092_p8, %p1086_p5 }
  0x22   :  { %v345_v28 = vsub.s32 32, %v344_v25  ;;  %v347_v30 = vshll.u32 %v1112_v29, %v344_v25  ;;  %v350_v32 = vshll.u32 %v1113_v31, %v344_v25  ;;  %v353_v34 = vshll.u32 %v1114_v33, %v344_v25 }
  0x23   :  { %v1188_v35 = vmul.f32 6.2831855, %v100_v23  ;;  %v356_v37 = vshll.u32 %v1115_v36, %v344_v25  ;;  %v359_v39 = vshll.u32 %v1116_v38, %v344_v25  ;;  %vm362_vm2 = vcmp.lt.s32.totalorder %v343_v27, 1 }
  0x24   :  { %v346_v40 = vshrl.u32 %v1112_v29, %v345_v28  ;;  %v348_v41 = vshrl.u32 %v1113_v31, %v345_v28  ;;  %v351_v42 = vshrl.u32 %v1114_v33, %v345_v28  ;;  %v354_v43 = vshrl.u32 %v1115_v36, %v345_v28 }
  0x25   :  { %v357_v45 = vshrl.u32 %v1116_v38, %v345_v28  ;;  %v360_v47 = vshrl.u32 %v1117_v46, %v345_v28  ;;  %v105_v51 = vand.u32 2139095040, %v1188_v35  ;;  %vm364_vm3 = vcmp.lt.s32.totalorder %v343_v27, 3 }
  0x26   :  { %v349_v48 = vor.u32 %v348_v41, %v347_v30  ;;  %v352_v49 = vor.u32 %v351_v42, %v350_v32  ;;  %v355_v50 = vor.u32 %v354_v43, %v353_v34  ;;  %vm365_vm4 = vcmp.lt.s32.totalorder %v343_v27, 4 }
  0x27   :  { %v358_v52 = vor.u32 %v357_v45, %v356_v37  ;;  %v361_v53 = vor.u32 %v360_v47, %v359_v39  ;;  %vm363_vm5 = vcmp.lt.s32.totalorder %v343_v27, 2  ;;  %v106_v62 = vshrl.u32 %v105_v51, 23 }
  0x28   :  { %v366_v54 = vsel %vm362_vm2, %v346_v40, %v349_v48  ;;  %v367_v55 = vsel %vm365_vm4, %v355_v50, 2102212464  ;;  %v370_v56 = vsel %vm362_vm2, %v349_v48, %v352_v49  ;;  %v374_v60 = vsel %vm362_vm2, %v352_v49, %v355_v50 }
  0x29   :  { %v368_v58 = vsel %vm364_vm3, %v352_v49, %v367_v55  ;;  %v371_v59 = vsel %vm365_vm4, %v358_v52, 920167782  ;;  %v375_v61 = vsel %vm365_vm4, %v361_v53, 1326507024  ;;  %v1012_v13 = vadd.s32 4294967169, %v106_v62 }
  0x2a   :  { %v369_v63 = vsel %vm363_vm5, %v366_v54, %v368_v58  ;;  %v372_v0 = vsel %vm364_vm3, %v355_v50, %v371_v59  ;;  %v376_v1 = vsel %vm364_vm3, %v358_v52, %v375_v61  ;;  %v102_v37 = vand.u32 2147483647, %v1188_v35 }
  0x2b   :  { %v373_v2 = vsel %vm363_vm5, %v370_v56, %v372_v0  ;;  %v377_v5 = vsel %vm363_vm5, %v374_v60, %v376_v1  ;;  %v112_v14 = vadd.s32 1, %v1012_v13  ;;  %v385_v16 = vmul.u32 %v378_v57, %v369_v63 }
  0x2c   :  { %v1196_v6 = vmul.u32.u64.low %v378_v57, %v377_v5  ;;  %v1197_v7 = vmul.u32.u64.high %v378_v57, %v377_v5, %v1196_v6  ;;  %v1199_v11 = vmul.u32.u64.low %v378_v57, %v373_v2  ;;  %v1200_v12 = vmul.u32.u64.high %v378_v57, %v373_v2, %v1199_v11 }
  0x2d   :  { %vm113_vm7 = vcmp.gt.s32.totalorder %v112_v14, 0  ;;  %v109_v52 = vand.u32 8388607, %v102_v37 }
  0x2e   :  { %vm387_vm6 = vc.u32 %v1197_v7, %v1199_v11  ;;  %v388_v15 = vadd.s32 1, %v1200_v12  ;;  %v114_v19 = vsel %vm113_vm7, %v112_v14, 0  ;;  %v386_v20 = vadd.s32 %v1199_v11, %v1197_v7  ;;  %v326_v7 = vld [vmem:[%s1503_s3] sm:$0xff]  ;;  %s1009_s3 = sld [smem:[#allocation2 + $0x8]] }
  0x2f   :  { %v116_v23 = vand.u32 31, %v114_v19  ;;  %v1211_v39 = vshrl.u32 %v114_v19, 5  ;;  %v110_v57 = vor.u32 8388608, %v109_v52 }
  0x30   :  { %v389_v17 = vsel %vm387_vm6, %v388_v15, %v1200_v12  ;;  %vm422_vm6 = vweird.f32 %v1174_v9 }
  0x31   :  { %v390_v18 = vadd.s32 %v389_v17, %v385_v16  ;;  %v117_v26 = vsub.s32 32, %v116_v23  ;;  %v128_v30 = vshll.u32 %v1115_v36, %v116_v23  ;;  %v131_v40 = vshll.u32 %v1116_v38, %v116_v23 }
  0x32   :  { %v119_v42 = vshll.u32 %v1112_v29, %v116_v23  ;;  %v122_v43 = vshll.u32 %v1113_v31, %v116_v23  ;;  %v125_v48 = vshll.u32 %v1114_v33, %v116_v23  ;;  %vm137_vm8 = vcmp.lt.s32.totalorder %v1211_v39, 4 }
  0x33   :  { %v391_v21 = vadd.s32 536870912, %v390_v18  ;;  %v129_v32 = vshrl.u32 %v1116_v38, %v117_v26  ;;  %v132_v41 = vshrl.u32 %v1117_v46, %v117_v26  ;;  %v120_v45 = vshrl.u32 %v1113_v31, %v117_v26 }
  0x34   :  { %v123_v47 = vshrl.u32 %v1114_v33, %v117_v26  ;;  %v126_v49 = vshrl.u32 %v1115_v36, %v117_v26  ;;  %vm134_vm9 = vcmp.lt.s32.totalorder %v1211_v39, 1  ;;  %vm136_vm10 = vcmp.lt.s32.totalorder %v1211_v39, 3 }
  0x35   :  { %v1206_v24 = vshrl.u32 %v391_v21, 30  ;;  %v130_v50 = vor.u32 %v129_v32, %v128_v30  ;;  %v133_v38 = vor.u32 %v132_v41, %v131_v40  ;;  %v121_v31 = vor.u32 %v120_v45, %v119_v42 }
  0x36   :  { %v124_v46 = vor.u32 %v123_v47, %v122_v43  ;;  %v127_v53 = vor.u32 %v126_v49, %v125_v48  ;;  %vm135_vm12 = vcmp.lt.s32.totalorder %v1211_v39, 2  ;;  %v150_v5 = vshll.u32 %v110_v57, 8 }
  0x37   :  { %v393_v25 = vshll.u32 %v1206_v24, 30  ;;  %v143_v33 = vsel %vm137_vm8, %v130_v50, 920167782  ;;  %v147_v58 = vsel %vm137_vm8, %v133_v38, 1326507024  ;;  %v118_v19 = vshrl.u32 %v1112_v29, %v117_v26 }
  0x38   :  { %v142_v61 = vsel %vm134_vm9, %v121_v31, %v124_v46  ;;  %v144_v62 = vsel %vm136_vm10, %v127_v53, %v143_v33  ;;  %v146_v63 = vsel %vm134_vm9, %v124_v46, %v127_v53  ;;  %v148_v0 = vsel %vm136_vm10, %v130_v50, %v147_v58 }
  0x39   :  { %v394_v27 = vsub.s32 %v390_v18, %v393_v25  ;;  %v145_v6 = vsel %vm135_vm12, %v142_v61, %v144_v62  ;;  %v149_v12 = vsel %vm135_vm12, %v146_v63, %v148_v0  ;;  %v327_v17 = vmul.f32 7.2929, %v326_v7 }
  0x3a   :  { %v1244_v15 = vmul.u32.u64.low %v150_v5, %v145_v6  ;;  %v1245_v16 = vmul.u32.u64.high %v150_v5, %v145_v6, %v1244_v15  ;;  %v416_v18 = vsub.s32 4, %v1206_v24  ;;  %v139_v25 = vsel %vm137_vm8, %v127_v53, 2102212464 }
  0x3b   :  { %v396_v28 = vsub.s32 0, %v394_v27  ;;  %v138_v32 = vsel %vm134_vm9, %v118_v19, %v121_v31  ;;  %v140_v29 = vsel %vm136_vm10, %v124_v46, %v139_v25  ;;  %vm104_vm8 = vcmp.lt.s32.totalorder %v1188_v35, 0 }
  0x3c   :  { %v417_v30 = vsel %vm332_vm13, %v416_v18, %v1206_v24  ;;  %v141_v41 = vsel %vm135_vm12, %v138_v32, %v140_v29  ;;  %v160_v42 = vadd.s32 1, %v1245_v16  ;;  %v66_v32 = vstv %s1009_s3 }
  0x3d   :  { %v1021_v34 = vmin.u32 %v396_v28, %v394_v27  ;;  %v328_v28 = vadd.f32 0.7071, %v327_v17  ;;  %v419_v40 = vsel %vm331_vm14, 0, %v417_v30  ;;  %v157_v24 = vmul.u32 %v150_v5, %v141_v41 }
  0x3e   :  { %v526_v22 = vadd.s32 3, %v419_v40  ;;  %v423_v45 = vand.u32 3, %v419_v40  ;;  %vm1290_vm9 = vcmp.le.f32.partialorder %v102_v37, 0.7853982 }
  0x3f   :  { %v398_v44 = vclz %v1021_v34  ;;  %v537_v43 = vmul.f32 2.0, %v328_v28 }
  0x40   :  { %v527_v47 = vand.u32 3, %v526_v22  ;;  %vm428_vm0 = vcmp.eq.s32.totalorder %v423_v45, 2  ;;  %vm425_vm2 = vcmp.eq.s32.totalorder %v423_v45, 0  ;;  %vm424_vm4 = vcmp.lt.s32.totalorder %v423_v45, 2 }
  0x41   :  { %v1022_v51 = vadd.s32 4294967294, %v398_v44  ;;  %v63_v45 = vstv %s1010_s28 }
  0x42   :  { %vm532_vm1 = vcmp.eq.s32.totalorder %v527_v47, 2  ;;  %vm529_vm3 = vcmp.eq.s32.totalorder %v527_v47, 0  ;;  %vm528_vm5 = vcmp.lt.s32.totalorder %v527_v47, 2 }
  0x43   :  { %vm1023_vm11 = vcmp.lt.s32.totalorder %v1022_v51, 0 }
  0x44   :  { %v401_v54 = vsel %vm1023_vm11, 0, %v1022_v51 }
  0x45   :  { %v402_v36 = vsub.s32 32, %v401_v54  ;;  %v403_v55 = vshll.u32 %v394_v27, %v401_v54  ;;  %v406_v56 = vsub.s32 4294967266, %v401_v54 }
  0x47   :  { %v404_v59 = vshrl.u32 %v386_v20, %v402_v36  ;;  %v407_v60 = vadd.s32 127, %v406_v56  ;;  %v1250_v20 = vmul.u32.u64.low %v150_v5, %v149_v12  ;;  %v1251_v21 = vmul.u32.u64.high %v150_v5, %v149_v12, %v1250_v20 }
  0x49   :  { %v405_v1 = vor.u32 %v404_v59, %v403_v55  ;;  %v408_v2 = vshll.u32 %v407_v60, 23  ;;  %vm159_vm15 = vc.u32 %v1251_v21, %v1244_v15  ;;  %v158_v12 = vadd.s32 %v1244_v15, %v1251_v21 }
  0x4a   :  { %v161_v44 = vsel %vm159_vm15, %v160_v42, %v1245_v16  ;;  %v67_v15 = vadd.f32 %v66_v32, %v1177_v10 }
  0x4b   :  { %v409_v11 = vor.u32 4788187, %v408_v2  ;;  %v412_v13 = vcvt.s32.f32 %v405_v1  ;;  %v162_v48 = vadd.s32 %v161_v44, %v157_v24 }
  0x4c   :  { %v68_v42 = vmul.f32 0.00016666666, %v67_v15 }
  0x4d   :  { %v410_v14 = vand.u32 2147483647, %v409_v11  ;;  %v163_v50 = vadd.s32 536870912, %v162_v48 }
  0x4e   :  { %v69_v47 = vfloor.f32 %v68_v42 }
  0x4f   :  { %v413_v23 = vmul.f32 %v412_v13, %v410_v14  ;;  %v164_v33 = vshrl.u32 %v163_v50, 30 }
  0x51   :  { %v414_v27 = vxor.u32 2147483648, %v413_v23  ;;  %v165_v58 = vshll.u32 %v164_v33, 30  ;;  %v188_v22 = vsub.s32 4, %v164_v33 }
  0x53   :  { %v415_v26 = vsel %vm332_vm13, %v414_v27, %v413_v23  ;;  %v166_v61 = vsub.s32 %v162_v48, %v165_v58  ;;  %v189_v48 = vsel %vm104_vm8, %v188_v22, %v164_v33 }
  0x54   :  { %v418_v34 = vsel %vm331_vm14, %v1174_v9, %v415_v26  ;;  %v191_v50 = vsel %vm1290_vm9, 0, %v189_v48 }
  0x55   :  { %1053 = vcosq.f32 %v418_v34  ;;  %v168_v62 = vsub.s32 0, %v166_v61 }
  0x56   :  { %1055 = vsinq.f32 %v418_v34 }
  0x57   :  { %1057 = vrcp.f32 %v537_v43  ;;  %v1013_v1 = vmin.u32 %v168_v62, %v166_v61 }
  0x59   :  { %v170_v5 = vclz %v1013_v1 }
  0x5b   :  { %v1014_v6 = vadd.s32 4294967294, %v170_v5 }
  0x5d   :  { %vm1015_vm7 = vcmp.lt.s32.totalorder %v1014_v6, 0 }
  0x5e   :  { %v173_v7 = vsel %vm1015_vm7, 0, %v1014_v6  ;;  %vm566_vm7 = vcmp.ge.s32.totalorder %v1172_v8, 2 }
  0x5f   :  { %v1054_v49 = vpop.eup %1053  ;;  %v178_v11 = vsub.s32 4294967266, %v173_v7  ;;  %v174_v13 = vsub.s32 32, %v173_v7  ;;  %v175_v16 = vshll.u32 %v166_v61, %v173_v7 }
  0x60   :  { %v1056_v39 = vpop.eup %1055  ;;  %v429_v51 = vxor.u32 2147483648, %v1054_v49 }
  0x61   :  { %v426_v52 = vxor.u32 2147483648, %v1056_v39  ;;  %v1058_v46 = vpop.eup %1057  ;;  %v179_v14 = vadd.s32 127, %v178_v11  ;;  %v176_v17 = vshrl.u32 %v158_v12, %v174_v13 }
  0x62   :  { %v430_v38 = vsel %vm428_vm0, %v429_v51, %v1056_v39  ;;  %v534_v31 = vsel %vm532_vm1, %v429_v51, %v1056_v39  ;;  %v70_v39 = vmul.f32 6000.0, %v69_v47  ;;  %vm194_vm0 = vweird.f32 %v1188_v35 }
  0x63   :  { %v427_v53 = vsel %vm425_vm2, %v1054_v49, %v426_v52  ;;  %v531_v54 = vsel %vm529_vm3, %v1054_v49, %v426_v52  ;;  %v180_v18 = vshll.u32 %v179_v14, 23  ;;  %v177_v19 = vor.u32 %v176_v17, %v175_v16 }
  0x64   :  { %v431_v36 = vsel %vm424_vm4, %v427_v53, %v430_v38  ;;  %v535_v55 = vsel %vm528_vm5, %v531_v54, %v534_v31  ;;  %v195_v38 = vadd.s32 3, %v191_v50  ;;  %v71_v31 = vsub.f32 %v67_v15, %v70_v39 }
  0x65   :  { %v536_v56 = vsel %vm422_vm6, nan, %v535_v55  ;;  %v1274_v60 = vsel %vm422_vm6, nan, %v431_v36  ;;  %v181_v20 = vor.u32 4788187, %v180_v18  ;;  %v184_v25 = vcvt.s32.f32 %v177_v19 }
  0x66   :  { %v1271_v57 = vmul.f32 %v1058_v46, %v536_v56  ;;  %v543_v9 = vsub.f32 1.0, %v1274_v60  ;;  %v196_v55 = vand.u32 3, %v195_v38  ;;  %v72_v56 = vmul.f32 0.00016669444, %v71_v31 }
  0x67   :  { %v182_v23 = vand.u32 2147483647, %v181_v20  ;;  %v206_v14 = vstv %s1011_s29  ;;  %v306_v16 = vand.u32 3, %v191_v50  ;;  %v89_v20 = vstv %s1008_s6 }
  0x68   :  { %v540_v59 = vadd.f32 1.0, %v1271_v57  ;;  %v544_v63 = vmul.f32 0.5, %v543_v9  ;;  %vm198_vm11 = vcmp.eq.s32.totalorder %v196_v55, 0  ;;  %vm201_vm12 = vcmp.eq.s32.totalorder %v196_v55, 2 }
  0x69   :  { %v185_v27 = vmul.f32 %v184_v25, %v182_v23  ;;  %v73_v62 = vsub.f32 1.0, %v72_v56  ;;  %vm197_vm14 = vcmp.lt.s32.totalorder %v196_v55, 2  ;;  %vm308_vm1 = vcmp.eq.s32.totalorder %v306_v16, 0 }
  0x6a   :  { %1059 = vrcp.f32 %v540_v59  ;;  %vm311_vm2 = vcmp.eq.s32.totalorder %v306_v16, 2  ;;  %vm307_vm3 = vcmp.lt.s32.totalorder %v306_v16, 2  ;;  %v211_v15 = vstv %s210_s8 }
  0x6b   :  { %v186_v29 = vxor.u32 2147483648, %v185_v27  ;;  %v547_v22 = vmul.f32 -2.0, %v1274_v60  ;;  %vm564_vm5 = vcmp.ge.s32.totalorder %v1163_v3, 2  ;;  %vm555_vm6 = vcmp.ge.s32.totalorder %v1163_v3, 1 }
  0x6d   :  { %v187_v40 = vsel %vm104_vm8, %v186_v29, %v185_v27  ;;  %vm557_vm8 = vcmp.ge.s32.totalorder %v1172_v8, 1 }
  0x6e   :  { %v190_v24 = vsel %vm1290_vm9, %v1188_v35, %v187_v40  ;;  %v321_v35 = vstv %s1004_s9  ;;  %vm630_vm9 = vcmp.ge.s32.totalorder %v1163_v3, 4 }
  0x6f   :  { %1061 = vcosq.f32 %v190_v24 }
  0x70   :  { %1063 = vsinq.f32 %v190_v24 }
  0x74   :  { %v1279_v0 = vpop.eup %1059 }
  0x75   :  { %v1282_v2 = vmul.f32 %v1279_v0, %v544_v63  ;;  %v546_v40 = vmul.f32 %v1279_v0, %v543_v9 }
  0x79   :  { %v1062_v53 = vpop.eup %1061 }
  0x7a   :  { %v1064_v54 = vpop.eup %1063  ;;  %v202_v59 = vxor.u32 2147483648, %v1062_v53 }
  0x7b   :  { %v199_v33 = vxor.u32 2147483648, %v1064_v54 }
  0x7c   :  { %v203_v5 = vsel %vm201_vm12, %v202_v59, %v1064_v54  ;;  %v313_v18 = vsel %vm311_vm2, %v202_v59, %v1064_v54  ;;  %vm747_vm12 = vcmp.ge.s32.totalorder %v1163_v3, 32  ;;  %vm965_vm2 = vcmp.eq.s32.totalorder %v1165_v4, 7 }
  0x7d   :  { %v200_v1 = vsel %vm198_vm11, %v1062_v53, %v199_v33  ;;  %vm708_vm11 = vcmp.ge.s32.totalorder %v1163_v3, 16 }
  0x7e   :  { %v204_v12 = vsel %vm197_vm14, %v200_v1, %v203_v5  ;;  %vm825_vm14 = vcmp.eq.s32.totalorder %v1163_v3, 127 }
  0x7f   :  { %v205_v13 = vsel %vm194_vm0, nan, %v204_v12 }
  0x80   :  { %v207_v17 = vmul.f32 %v206_v14, %v205_v13 }
  0xa7   :  { %v55_v28 = vpop.xlane.xlu0 %54 }
  0xa8   :  { %v56_v30 = vrot.slane %v55_v28, 4 }
  0xaa   :  { %v57_v26 = vmin.f32 %v55_v28, %v56_v30  ;;  %v316_v30 = vstv %s1003_s30 }
  0xac   :  { %v58_v21 = vrot.slane %v57_v26, 2 }
  0xae   :  { %v59_v41 = vmin.f32 %v57_v26, %v58_v21 }
  0xb0   :  { %v60_v43 = vrot.slane %v59_v41, 1 }
  0xb2   :  { %v61_v44 = vmin.f32 %v59_v41, %v60_v43 }
  0xb4   :  { %vm62_vm10 = vcmp.eq.f32.partialorder %v61_v44, 0.0 }
  0xb5   :  { %v64_v37 = vsel %vm62_vm10, 1024.0, %v63_v45  ;;  %vm669_vm10 = vcmp.ge.s32.totalorder %v1163_v3, 8 }
  0xb6   :  { %v65_v49 = vmax.f32 %v61_v44, %v64_v37  ;;  %vm81_vm15 = vcmp.lt.f32.partialorder %v1177_v10, %v64_v37  ;;  %v548_v44 = vmul.f32 %v1279_v0, %v547_v22 }
  0xb8   :  { %v74_v51 = vsub.f32 %v1177_v10, %v65_v49  ;;  %vm82_vm13 = vcmp.ge.f32.partialorder %v1177_v10, %v65_v49  ;;  %v310_v10 = vsel %vm308_vm1, %v1062_v53, %v199_v33  ;;  %v570_v54 = vsub.f32 0.0, %v548_v44 }
  0xb9   :  { %v314_v25 = vsel %vm307_vm3, %v310_v10, %v313_v18  ;;  %v1120_v33 = vmov 0.0   ;;  %vm910_vm1 = vcmp.ge.s32.totalorder %v1165_v4, 4  ;;  %vm980_vm3 = vcmask 1040384  }
  0xba   :  { %v75_v52 = vmul.f32 0.00016666666, %v74_v51  ;;  %v315_v28 = vsel %vm194_vm0, nan, %v314_v25  ;;  %vm877_vm0 = vcmp.ge.s32.totalorder %v1165_v4, 2 }
  0xbb   :  { %v317_v29 = vmul.f32 %v316_v30, %v315_v28 }
  0xbc   :  { %v76_v46 = vfloor.f32 %v75_v52 }
  0xbd   :  { %v318_v34 = vadd.f32 1.0, %v317_v29 }
  0xbe   :  { %v77_v36 = vmul.f32 6000.0, %v76_v46  ;;  %v549_v46 = vsub.f32 1.0, %v1271_v57 }
  0xc0   :  { %v78_v58 = vsub.f32 %v74_v51, %v77_v36  ;;  %v550_v8 = vmul.f32 %v1279_v0, %v549_v46 }
  0xc2   :  { %v79_v61 = vmul.f32 0.00016669444, %v78_v58  ;;  %v571_v36 = vsub.f32 0.0, %v550_v8 }
  0xc4   :  { %v80_v63 = vsub.f32 1.0, %v79_v61 }
  0xc6   :  { %v83_v6 = vsel %vm82_vm13, %v80_v63, 0.0  ;;  %vm786_vm13 = vcmp.ge.s32.totalorder %v1163_v3, 64 }
  0xc7   :  { %v1302_v7 = vsel %vm81_vm15, %v73_v62, %v83_v6  ;;  %vm844_vm15 = vcmp.ge.s32.totalorder %v1165_v4, 1 }
  0xc8   :  { %v86_v11 = vmax.f32 %v1302_v7, 1e-30  ;;  %vm85_vm4 = vcmp.gt.f32.partialorder %v1302_v7, 0.0 }
  0xca   :  { %1065 = vlog2.f32 %v86_v11 }
  0xcb   :  { %1067 = vtanh.f32 %v207_v17 }
  0xd4   :  { %v1066_v19 = vpop.eup %1065 }
  0xd5   :  { %v88_v23 = vmul.f32 0.6931472, %v1066_v19  ;;  %v1068_v26 = vpop.eup %1067 }
  0xd6   :  { %v212_v21 = vmul.f32 %v1068_v26, %v211_v15 }
  0xd7   :  { %v90_v27 = vmul.f32 %v89_v20, %v88_v23 }
  0xd8   :  { %v319_v41 = vmul.f32 %v318_v34, %v212_v21 }
  0xd9   :  { %v91_v32 = vmul.f32 1.442695, %v90_v27 }
  0xdb   :  { %1069 = vpow2.f32 %v91_v32 }
  0xe5   :  { %v1070_v42 = vpop.eup %1069 }
  0xe6   :  { %v93_v43 = vsel %vm85_vm4, %v1070_v42, 0.0 }
  0xe7   :  { %v320_v24 = vmul.f32 %v319_v41, %v93_v43 }
  0xe9   :  { %v322_v45 = vmul.f32 %v321_v35, %v320_v24 }
  0xeb   :  { %561 = vrot.lane.b32.xlu1 %v322_v45, %s1118_s10  ;;  %552 = vrot.lane.b32.xlu0 %v322_v45, %s1119_s11  ;;  %v551_v47 = vmul.f32 %v1282_v2, %v322_v45 }
 0x15d   :  { %v562_v9 = vpop.permute.xlu1 %561  ;;  %v553_v48 = vpop.permute.xlu0 %552 }
 0x15e   :  { %v563_v60 = vrot.slane %v562_v9, 7  ;;  %v554_v37 = vrot.slane %v553_v48, 7 }
 0x160   :  { %v565_v49 = vsel %vm564_vm5, %v562_v9, %v563_v60  ;;  %v556_v39 = vsel %vm555_vm6, %v553_v48, %v554_v37 }
 0x161   :  { %v567_v50 = vsel %vm566_vm7, %v565_v49, 0.0  ;;  %v558_v51 = vsel %vm557_vm8, %v556_v39, 0.0 }
 0x162   :  { %v559_v52 = vmul.f32 %v558_v51, %v546_v40  ;;  %v568_v38 = vmul.f32 %v567_v50, %v1282_v2  ;;  %v1028_v2 = vsel %vm555_vm6, 1.0, %v1120_v33 }
 0x163   :  { %v587_v59 = vsub.f32 1.0, %v1028_v2  ;;  %v584_v0 = vmul.f32 %v1028_v2, %v571_v36 }
 0x164   :  { %v560_v31 = vadd.f32 %v559_v52, %v551_v47 }
 0x165   :  { %v588_v63 = vmul.f32 %v587_v59, %v571_v36 }
 0x166   :  { %v569_v53 = vadd.f32 %v568_v38, %v560_v31 }
 0x168   :  { %580 = vrot.lane.b32.xlu1 %v569_v53, %s1119_s11 }
 0x16c   :  { %574 = vrot.lane.b32.xlu1 %v570_v54, %s1119_s11 }
 0x170   :  { %577 = vrot.lane.b32.xlu1 %v571_v36, %s1119_s11 }
 0x1da   :  { %v581_v55 = vpop.permute.xlu1 %580 }
 0x1db   :  { %v582_v56 = vsel %vm555_vm6, %v581_v55, 0.0 }
 0x1dc   :  { %v590_v58 = vmul.f32 %v582_v56, %v570_v54 }
 0x1de   :  { %v575_v61 = vpop.permute.xlu1 %574  ;;  %v591_v57 = vadd.f32 %v590_v58, %v569_v53 }
 0x1df   :  { %v576_v62 = vsel %vm555_vm6, %v575_v61, 1.0 }
 0x1e0   :  { %604 = vrot.lane.b32.xlu1 %v591_v57, %s1118_s10  ;;  %v583_v1 = vmul.f32 %v576_v62, %v570_v54 }
 0x1e2   :  { %v578_v5 = vpop.permute.xlu1 %577  ;;  %v585_v12 = vadd.f32 %v584_v0, %v583_v1 }
 0x1e3   :  { %v579_v6 = vsel %vm555_vm6, %v578_v5, 0.0 }
 0x1e4   :  { %v586_v11 = vmul.f32 %v579_v6, %v570_v54  ;;  %607 = vrot.lane.b32.xlu1 %v582_v56, %s1118_s10 }
 0x1e6   :  { %v589_v13 = vadd.f32 %v588_v63, %v586_v11 }
 0x1e8   :  { %592 = vrot.lane.b32.xlu1 %v585_v12, %s1118_s10  ;;  %595 = vrot.lane.b32.xlu0 %v589_v13, %s1118_s10 }
 0x1ec   :  { %598 = vrot.lane.b32.xlu1 %v576_v62, %s1118_s10  ;;  %601 = vrot.lane.b32.xlu0 %v579_v6, %s1118_s10 }
 0x252   :  { %v605_v14 = vpop.permute.xlu1 %604 }
 0x253   :  { %v606_v16 = vsel %vm564_vm5, %v605_v14, 0.0 }
 0x254   :  { %v622_v18 = vmul.f32 %v606_v16, %v585_v12  ;;  %v626_v19 = vmul.f32 %v606_v16, %v576_v62 }
 0x256   :  { %v608_v17 = vpop.permute.xlu1 %607 }
 0x257   :  { %v609_v10 = vsel %vm564_vm5, %v608_v17, 0.0 }
 0x258   :  { %v623_v20 = vmul.f32 %v609_v10, %v589_v13  ;;  %v627_v23 = vmul.f32 %v609_v10, %v579_v6 }
 0x25a   :  { %v624_v25 = vadd.f32 %v623_v20, %v622_v18  ;;  %v628_v27 = vadd.f32 %v627_v23, %v626_v19  ;;  %v596_v28 = vpop.permute.xlu0 %595  ;;  %v593_v30 = vpop.permute.xlu1 %592 }
 0x25b   :  { %v597_v32 = vsel %vm564_vm5, %v596_v28, 0.0  ;;  %v594_v29 = vsel %vm564_vm5, %v593_v30, 1.0 }
 0x25c   :  { %v629_v26 = vadd.f32 %v628_v27, %v582_v56  ;;  %v625_v15 = vadd.f32 %v624_v25, %v591_v57  ;;  %v613_v42 = vmul.f32 %v597_v32, %v585_v12  ;;  %v610_v43 = vmul.f32 %v594_v29, %v585_v12 }
 0x25d   :  { %v619_v9 = vmul.f32 %v597_v32, %v576_v62  ;;  %v616_v48 = vmul.f32 %v594_v29, %v576_v62 }
 0x25e   :  { %v602_v21 = vpop.permute.xlu0 %601  ;;  %v599_v34 = vpop.permute.xlu1 %598  ;;  %646 = vrot.lane.b32.xlu0 %v629_v26, %s1121_s12  ;;  %643 = vrot.lane.b32.xlu1 %v625_v15, %s1121_s12 }
 0x25f   :  { %v603_v40 = vsel %vm564_vm5, %v602_v21, 1.0  ;;  %v600_v41 = vsel %vm564_vm5, %v599_v34, 0.0 }
 0x260   :  { %v614_v35 = vmul.f32 %v603_v40, %v589_v13  ;;  %v611_v22 = vmul.f32 %v600_v41, %v589_v13  ;;  %v620_v44 = vmul.f32 %v603_v40, %v579_v6  ;;  %v617_v47 = vmul.f32 %v600_v41, %v579_v6 }
 0x262   :  { %v615_v24 = vadd.f32 %v614_v35, %v613_v42  ;;  %v612_v45 = vadd.f32 %v611_v22, %v610_v43  ;;  %v621_v60 = vadd.f32 %v620_v44, %v619_v9  ;;  %v618_v37 = vadd.f32 %v617_v47, %v616_v48 }
 0x264   :  { %634 = vrot.lane.b32.xlu0 %v615_v24, %s1121_s12  ;;  %631 = vrot.lane.b32.xlu1 %v612_v45, %s1121_s12 }
 0x268   :  { %640 = vrot.lane.b32.xlu0 %v621_v60, %s1121_s12  ;;  %637 = vrot.lane.b32.xlu1 %v618_v37, %s1121_s12 }
 0x2d0   :  { %v647_v49 = vpop.permute.xlu0 %646  ;;  %v644_v39 = vpop.permute.xlu1 %643 }
 0x2d1   :  { %v648_v50 = vsel %vm630_vm9, %v647_v49, 0.0  ;;  %v645_v51 = vsel %vm630_vm9, %v644_v39, 0.0 }
 0x2d2   :  { %v662_v52 = vmul.f32 %v648_v50, %v615_v24  ;;  %v666_v38 = vmul.f32 %v648_v50, %v621_v60  ;;  %v661_v31 = vmul.f32 %v645_v51, %v612_v45  ;;  %v665_v46 = vmul.f32 %v645_v51, %v618_v37 }
 0x2d4   :  { %v663_v53 = vadd.f32 %v662_v52, %v661_v31  ;;  %v667_v54 = vadd.f32 %v666_v38, %v665_v46 }
 0x2d6   :  { %v635_v8 = vpop.permute.xlu0 %634  ;;  %v632_v36 = vpop.permute.xlu1 %631  ;;  %v668_v55 = vadd.f32 %v667_v54, %v629_v26  ;;  %v664_v56 = vadd.f32 %v663_v53, %v625_v15 }
 0x2d7   :  { %v636_v58 = vsel %vm630_vm9, %v635_v8, 0.0  ;;  %v633_v33 = vsel %vm630_vm9, %v632_v36, 1.0 }
 0x2d8   :  { %685 = vrot.lane.b32.xlu0 %v668_v55, %s1122_s13  ;;  %682 = vrot.lane.b32.xlu1 %v664_v56, %s1122_s13  ;;  %v652_v62 = vmul.f32 %v636_v58, %v612_v45  ;;  %v649_v0 = vmul.f32 %v633_v33, %v612_v45  ;;  %v658_v13 = vmul.f32 %v636_v58, %v618_v37 }
 0x2d9   :  { %v655_v14 = vmul.f32 %v633_v33, %v618_v37 }
 0x2da   :  { %v641_v2 = vpop.permute.xlu0 %640  ;;  %v638_v59 = vpop.permute.xlu1 %637 }
 0x2db   :  { %v642_v61 = vsel %vm630_vm9, %v641_v2, 1.0  ;;  %v639_v57 = vsel %vm630_vm9, %v638_v59, 0.0 }
 0x2dc   :  { %v653_v63 = vmul.f32 %v642_v61, %v615_v24  ;;  %v650_v1 = vmul.f32 %v639_v57, %v615_v24  ;;  %v659_v6 = vmul.f32 %v642_v61, %v621_v60  ;;  %v656_v12 = vmul.f32 %v639_v57, %v621_v60 }
 0x2de   :  { %v654_v5 = vadd.f32 %v653_v63, %v652_v62  ;;  %v651_v11 = vadd.f32 %v650_v1, %v649_v0  ;;  %v660_v16 = vadd.f32 %v659_v6, %v658_v13  ;;  %v657_v17 = vadd.f32 %v656_v12, %v655_v14 }
 0x2e0   :  { %673 = vrot.lane.b32.xlu0 %v654_v5, %s1122_s13  ;;  %670 = vrot.lane.b32.xlu1 %v651_v11, %s1122_s13 }
 0x2e4   :  { %679 = vrot.lane.b32.xlu0 %v660_v16, %s1122_s13  ;;  %676 = vrot.lane.b32.xlu1 %v657_v17, %s1122_s13 }
 0x34a   :  { %v686_v10 = vpop.permute.xlu0 %685  ;;  %v683_v18 = vpop.permute.xlu1 %682 }
 0x34b   :  { %v687_v19 = vsel %vm669_vm10, %v686_v10, 0.0  ;;  %v684_v20 = vsel %vm669_vm10, %v683_v18, 0.0 }
 0x34c   :  { %v701_v23 = vmul.f32 %v687_v19, %v654_v5  ;;  %v705_v25 = vmul.f32 %v687_v19, %v660_v16  ;;  %v700_v27 = vmul.f32 %v684_v20, %v651_v11  ;;  %v704_v28 = vmul.f32 %v684_v20, %v657_v17 }
 0x34e   :  { %v702_v30 = vadd.f32 %v701_v23, %v700_v27  ;;  %v706_v32 = vadd.f32 %v705_v25, %v704_v28 }
 0x350   :  { %v707_v29 = vadd.f32 %v706_v32, %v668_v55  ;;  %v703_v26 = vadd.f32 %v702_v30, %v664_v56 }
 0x352   :  { %v674_v15 = vpop.permute.xlu0 %673  ;;  %v671_v21 = vpop.permute.xlu1 %670  ;;  %724 = vrot.lane.b32.xlu0 %v707_v29, %s1123_s14  ;;  %721 = vrot.lane.b32.xlu1 %v703_v26, %s1123_s14 }
 0x353   :  { %v675_v34 = vsel %vm669_vm10, %v674_v15, 0.0  ;;  %v672_v40 = vsel %vm669_vm10, %v671_v21, 1.0 }
 0x354   :  { %v691_v22 = vmul.f32 %v675_v34, %v651_v11  ;;  %v688_v24 = vmul.f32 %v672_v40, %v651_v11  ;;  %v697_v37 = vmul.f32 %v675_v34, %v657_v17  ;;  %v694_v49 = vmul.f32 %v672_v40, %v657_v17 }
 0x356   :  { %v680_v41 = vpop.permute.xlu0 %679  ;;  %v677_v42 = vpop.permute.xlu1 %676 }
 0x357   :  { %v681_v43 = vsel %vm669_vm10, %v680_v41, 1.0  ;;  %v678_v35 = vsel %vm669_vm10, %v677_v42, 0.0 }
 0x358   :  { %v692_v44 = vmul.f32 %v681_v43, %v654_v5  ;;  %v689_v45 = vmul.f32 %v678_v35, %v654_v5  ;;  %v698_v9 = vmul.f32 %v681_v43, %v660_v16  ;;  %v695_v60 = vmul.f32 %v678_v35, %v660_v16 }
 0x35a   :  { %v693_v47 = vadd.f32 %v692_v44, %v691_v22  ;;  %v690_v48 = vadd.f32 %v689_v45, %v688_v24  ;;  %v699_v39 = vadd.f32 %v698_v9, %v697_v37  ;;  %v696_v50 = vadd.f32 %v695_v60, %v694_v49 }
 0x35c   :  { %712 = vrot.lane.b32.xlu0 %v693_v47, %s1123_s14  ;;  %709 = vrot.lane.b32.xlu1 %v690_v48, %s1123_s14 }
 0x360   :  { %718 = vrot.lane.b32.xlu0 %v699_v39, %s1123_s14  ;;  %715 = vrot.lane.b32.xlu1 %v696_v50, %s1123_s14 }
 0x3c4   :  { %v725_v51 = vpop.permute.xlu0 %724  ;;  %v722_v52 = vpop.permute.xlu1 %721 }
 0x3c5   :  { %v726_v38 = vsel %vm708_vm11, %v725_v51, 0.0  ;;  %v723_v31 = vsel %vm708_vm11, %v722_v52, 0.0 }
 0x3c6   :  { %v740_v46 = vmul.f32 %v726_v38, %v693_v47  ;;  %v744_v53 = vmul.f32 %v726_v38, %v699_v39  ;;  %v739_v54 = vmul.f32 %v723_v31, %v690_v48  ;;  %v743_v8 = vmul.f32 %v723_v31, %v696_v50 }
 0x3c8   :  { %v741_v36 = vadd.f32 %v740_v46, %v739_v54  ;;  %v745_v55 = vadd.f32 %v744_v53, %v743_v8 }
 0x3ca   :  { %v746_v56 = vadd.f32 %v745_v55, %v707_v29  ;;  %v742_v58 = vadd.f32 %v741_v36, %v703_v26 }
 0x3cc   :  { %763 = vrot.lane.b32.xlu0 %v746_v56, %s1124_s15  ;;  %760 = vrot.lane.b32.xlu1 %v742_v58, %s1124_s15 }
 0x3ce   :  { %v713_v33 = vpop.permute.xlu0 %712  ;;  %v710_v2 = vpop.permute.xlu1 %709 }
 0x3cf   :  { %v714_v59 = vsel %vm708_vm11, %v713_v33, 0.0  ;;  %v711_v61 = vsel %vm708_vm11, %v710_v2, 1.0 }
 0x3d0   :  { %v730_v1 = vmul.f32 %v714_v59, %v690_v48  ;;  %v727_v5 = vmul.f32 %v711_v61, %v690_v48  ;;  %v736_v17 = vmul.f32 %v714_v59, %v696_v50  ;;  %v733_v10 = vmul.f32 %v711_v61, %v696_v50 }
 0x3d2   :  { %v719_v57 = vpop.permute.xlu0 %718  ;;  %v716_v62 = vpop.permute.xlu1 %715 }
 0x3d3   :  { %v720_v0 = vsel %vm708_vm11, %v719_v57, 1.0  ;;  %v717_v63 = vsel %vm708_vm11, %v716_v62, 0.0 }
 0x3d4   :  { %v731_v6 = vmul.f32 %v720_v0, %v693_v47  ;;  %v728_v11 = vmul.f32 %v717_v63, %v693_v47  ;;  %v737_v13 = vmul.f32 %v720_v0, %v699_v39  ;;  %v734_v16 = vmul.f32 %v717_v63, %v699_v39 }
 0x3d6   :  { %v732_v12 = vadd.f32 %v731_v6, %v730_v1  ;;  %v729_v14 = vadd.f32 %v728_v11, %v727_v5  ;;  %v738_v18 = vadd.f32 %v737_v13, %v736_v17  ;;  %v735_v19 = vadd.f32 %v734_v16, %v733_v10 }
 0x3d8   :  { %751 = vrot.lane.b32.xlu0 %v732_v12, %s1124_s15  ;;  %748 = vrot.lane.b32.xlu1 %v729_v14, %s1124_s15 }
 0x3dc   :  { %757 = vrot.lane.b32.xlu0 %v738_v18, %s1124_s15  ;;  %754 = vrot.lane.b32.xlu1 %v735_v19, %s1124_s15 }
 0x43e   :  { %v764_v20 = vpop.permute.xlu0 %763  ;;  %v761_v23 = vpop.permute.xlu1 %760 }
 0x43f   :  { %v765_v28 = vsel %vm747_vm12, %v764_v20, 0.0  ;;  %v762_v30 = vsel %vm747_vm12, %v761_v23, 0.0 }
 0x440   :  { %v779_v26 = vmul.f32 %v765_v28, %v732_v12  ;;  %v783_v15 = vmul.f32 %v765_v28, %v738_v18  ;;  %v778_v21 = vmul.f32 %v762_v30, %v729_v14  ;;  %v782_v34 = vmul.f32 %v762_v30, %v735_v19 }
 0x442   :  { %v780_v45 = vadd.f32 %v779_v26, %v778_v21  ;;  %v784_v47 = vadd.f32 %v783_v15, %v782_v34 }
 0x444   :  { %v785_v49 = vadd.f32 %v784_v47, %v746_v56  ;;  %v781_v39 = vadd.f32 %v780_v45, %v742_v58 }
 0x44a   :  { %v752_v25 = vpop.permute.xlu0 %751  ;;  %v749_v27 = vpop.permute.xlu1 %748 }
 0x44b   :  { %v753_v32 = vsel %vm747_vm12, %v752_v25, 0.0  ;;  %v750_v29 = vsel %vm747_vm12, %v749_v27, 1.0 }
 0x44c   :  { %v769_v35 = vmul.f32 %v753_v32, %v729_v14  ;;  %v766_v22 = vmul.f32 %v750_v29, %v729_v14  ;;  %v775_v50 = vmul.f32 %v753_v32, %v735_v19  ;;  %v772_v51 = vmul.f32 %v750_v29, %v735_v19 }
 0x44e   :  { %v758_v40 = vpop.permute.xlu0 %757  ;;  %v755_v41 = vpop.permute.xlu1 %754 }
 0x44f   :  { %v759_v42 = vsel %vm747_vm12, %v758_v40, 1.0  ;;  %v756_v43 = vsel %vm747_vm12, %v755_v41, 0.0 }
 0x450   :  { %v770_v24 = vmul.f32 %v759_v42, %v732_v12  ;;  %v767_v44 = vmul.f32 %v756_v43, %v732_v12  ;;  %v776_v60 = vmul.f32 %v759_v42, %v738_v18  ;;  %v773_v37 = vmul.f32 %v756_v43, %v738_v18 }
 0x452   :  { %v771_v9 = vadd.f32 %v770_v24, %v769_v35  ;;  %v768_v48 = vadd.f32 %v767_v44, %v766_v22  ;;  %v777_v52 = vadd.f32 %v776_v60, %v775_v50  ;;  %v774_v38 = vadd.f32 %v773_v37, %v772_v51 }
 0x454   :  { %790 = vrot.lane.b32.xlu0 %v771_v9, %s1125_s16  ;;  %787 = vrot.lane.b32.xlu1 %v768_v48, %s1125_s16 }
 0x458   :  { %802 = vrot.lane.b32.xlu0 %v785_v49, %s1125_s16  ;;  %799 = vrot.lane.b32.xlu1 %v781_v39, %s1125_s16 }
 0x45c   :  { %796 = vrot.lane.b32.xlu0 %v777_v52, %s1125_s16  ;;  %793 = vrot.lane.b32.xlu1 %v774_v38, %s1125_s16 }
 0x4c6   :  { %v791_v31 = vpop.permute.xlu0 %790  ;;  %v788_v46 = vpop.permute.xlu1 %787 }
 0x4c7   :  { %v792_v8 = vsel %vm786_vm13, %v791_v31, 0.0  ;;  %v789_v36 = vsel %vm786_vm13, %v788_v46, 1.0 }
 0x4c8   :  { %v808_v62 = vmul.f32 %v792_v8, %v768_v48  ;;  %v805_v0 = vmul.f32 %v789_v36, %v768_v48  ;;  %v814_v23 = vmul.f32 %v792_v8, %v774_v38  ;;  %v811_v25 = vmul.f32 %v789_v36, %v774_v38 }
 0x4ca   :  { %v803_v53 = vpop.permute.xlu0 %802  ;;  %v800_v54 = vpop.permute.xlu1 %799 }
 0x4cb   :  { %v804_v55 = vsel %vm786_vm13, %v803_v53, 0.0  ;;  %v801_v56 = vsel %vm786_vm13, %v800_v54, 0.0 }
 0x4cc   :  { %v818_v58 = vmul.f32 %v804_v55, %v771_v9  ;;  %v822_v33 = vmul.f32 %v804_v55, %v777_v52  ;;  %v817_v2 = vmul.f32 %v801_v56, %v768_v48  ;;  %v821_v59 = vmul.f32 %v801_v56, %v774_v38 }
 0x4ce   :  { %v797_v61 = vpop.permute.xlu0 %796  ;;  %v794_v57 = vpop.permute.xlu1 %793  ;;  %v819_v5 = vadd.f32 %v818_v58, %v817_v2  ;;  %v823_v6 = vadd.f32 %v822_v33, %v821_v59 }
 0x4cf   :  { %v798_v63 = vsel %vm786_vm13, %v797_v61, 1.0  ;;  %v795_v1 = vsel %vm786_vm13, %v794_v57, 0.0 }
 0x4d0   :  { %v809_v11 = vmul.f32 %v798_v63, %v771_v9  ;;  %v806_v12 = vmul.f32 %v795_v1, %v771_v9  ;;  %v815_v16 = vmul.f32 %v798_v63, %v777_v52  ;;  %v812_v17 = vmul.f32 %v795_v1, %v777_v52 }
 0x4d1   :  { %v824_v19 = vadd.f32 %v823_v6, %v785_v49  ;;  %v1419_v20 = vadd.f32 %v819_v5, %v781_v39 }
 0x4d2   :  { %v1408_v13 = vadd.f32 %v806_v12, %v805_v0  ;;  %v1410_v14 = vadd.f32 %v809_v11, %v808_v62  ;;  %v813_v30 = vadd.f32 %v812_v17, %v811_v25  ;;  %v816_v32 = vadd.f32 %v815_v16, %v814_v23 }
 0x4d3   :  { %v841_v27 = vsel %vm825_vm14, %v824_v19, 0.0  ;;  %v838_v28 = vsel %vm825_vm14, %v1419_v20, 0.0 }
 0x4d4   :  { %v826_v10 = vsel %vm825_vm14, %v1408_v13, 0.0  ;;  %v829_v18 = vsel %vm825_vm14, %v1410_v14, 0.0  ;;  %v832_v29 = vsel %vm825_vm14, %v813_v30, 0.0  ;;  %v835_v26 = vsel %vm825_vm14, %v816_v32, 0.0 }
 0x4d5   :  { %827 = vadd.xlane.f32.xlu0 %v826_v10  ;;  %830 = vadd.xlane.f32.xlu1 %v829_v18 }
 0x4d9   :  { %842 = vadd.xlane.f32.xlu0 %v841_v27  ;;  %839 = vadd.xlane.f32.xlu1 %v838_v28 }
 0x4dd   :  { %833 = vadd.xlane.f32.xlu0 %v832_v29  ;;  %836 = vadd.xlane.f32.xlu1 %v835_v26 }
 0x562   :  { %v828_v15 = vpop.xlane.xlu0 %827  ;;  %v831_v21 = vpop.xlane.xlu1 %830 }
 0x563   :  { %v845_v34 = vrot.slane %v828_v15, 7  ;;  %v847_v40 = vrot.slane %v831_v21, 7 }
 0x565   :  { %v846_v45 = vsel %vm844_vm15, %v845_v34, 1.0  ;;  %v848_v9 = vsel %vm844_vm15, %v847_v40, 0.0 }
 0x566   :  { %v843_v41 = vpop.xlane.xlu0 %842  ;;  %v840_v42 = vpop.xlane.xlu1 %839  ;;  %v857_v51 = vmul.f32 %v846_v45, %v828_v15  ;;  %v860_v52 = vmul.f32 %v848_v9, %v828_v15 }
 0x567   :  { %v855_v43 = vrot.slane %v843_v41, 7  ;;  %v853_v35 = vrot.slane %v840_v42, 7 }
 0x569   :  { %v856_v22 = vsel %vm844_vm15, %v855_v43, 0.0  ;;  %v854_v24 = vsel %vm844_vm15, %v853_v35, 0.0 }
 0x56a   :  { %v870_v3 = vmul.f32 %v856_v22, %v831_v21  ;;  %v869_v44 = vmul.f32 %v854_v24, %v828_v15  ;;  %v834_v47 = vpop.xlane.xlu0 %833  ;;  %v837_v48 = vpop.xlane.xlu1 %836 }
 0x56b   :  { %v849_v60 = vrot.slane %v834_v47, 7  ;;  %v873_v37 = vmul.f32 %v854_v24, %v834_v47  ;;  %v851_v39 = vrot.slane %v837_v48, 7  ;;  %v874_v50 = vmul.f32 %v856_v22, %v837_v48 }
 0x56c   :  { %v871_v49 = vadd.f32 %v870_v3, %v869_v44  ;;  %v863_v38 = vmul.f32 %v846_v45, %v834_v47  ;;  %v866_v36 = vmul.f32 %v848_v9, %v834_v47  ;;  %v943_v9 = vstv %s1446_s17 }
 0x56d   :  { %v850_v31 = vsel %vm844_vm15, %v849_v60, 0.0  ;;  %v852_v54 = vsel %vm844_vm15, %v851_v39, 1.0  ;;  %v875_v58 = vadd.f32 %v874_v50, %v873_v37 }
 0x56e   :  { %v872_v46 = vadd.f32 %v871_v49, %v840_v42  ;;  %v858_v53 = vmul.f32 %v850_v31, %v831_v21  ;;  %v864_v8 = vmul.f32 %v850_v31, %v837_v48  ;;  %v861_v55 = vmul.f32 %v852_v54, %v831_v21 }
 0x56f   :  { %v867_v56 = vmul.f32 %v852_v54, %v837_v48  ;;  %v876_v62 = vadd.f32 %v875_v58, %v843_v41  ;;  %v945_v49 = vstv %s1006_s18 }
 0x570   :  { %v886_v33 = vrot.slane %v872_v46, 6  ;;  %v859_v2 = vadd.f32 %v858_v53, %v857_v51  ;;  %v865_v59 = vadd.f32 %v864_v8, %v863_v38  ;;  %v862_v61 = vadd.f32 %v861_v55, %v860_v52 }
 0x571   :  { %v868_v57 = vadd.f32 %v867_v56, %v866_v36  ;;  %v888_v11 = vrot.slane %v876_v62, 6 }
 0x572   :  { %v887_v0 = vsel %vm877_vm0, %v886_v33, 0.0  ;;  %v878_v63 = vrot.slane %v859_v2, 6  ;;  %v882_v1 = vrot.slane %v865_v59, 6  ;;  %v880_v5 = vrot.slane %v862_v61, 6 }
 0x573   :  { %v884_v6 = vrot.slane %v868_v57, 6  ;;  %v902_v16 = vmul.f32 %v887_v0, %v859_v2  ;;  %v906_v10 = vmul.f32 %v887_v0, %v865_v59  ;;  %v889_v25 = vsel %vm877_vm0, %v888_v11, 0.0 }
 0x574   :  { %v879_v12 = vsel %vm877_vm0, %v878_v63, 1.0  ;;  %v883_v17 = vsel %vm877_vm0, %v882_v1, 0.0  ;;  %v881_v19 = vsel %vm877_vm0, %v880_v5, 0.0  ;;  %v903_v21 = vmul.f32 %v889_v25, %v862_v61 }
 0x575   :  { %v890_v18 = vmul.f32 %v879_v12, %v859_v2  ;;  %v885_v23 = vsel %vm877_vm0, %v884_v6, 1.0  ;;  %v891_v27 = vmul.f32 %v883_v17, %v862_v61  ;;  %v893_v28 = vmul.f32 %v881_v19, %v859_v2 }
 0x576   :  { %v894_v30 = vmul.f32 %v885_v23, %v862_v61  ;;  %v896_v32 = vmul.f32 %v879_v12, %v865_v59  ;;  %v897_v29 = vmul.f32 %v883_v17, %v868_v57  ;;  %v899_v26 = vmul.f32 %v881_v19, %v865_v59 }
 0x577   :  { %v900_v15 = vmul.f32 %v885_v23, %v868_v57  ;;  %v892_v34 = vadd.f32 %v891_v27, %v890_v18  ;;  %v907_v41 = vmul.f32 %v889_v25, %v868_v57  ;;  %v904_v35 = vadd.f32 %v903_v21, %v902_v16 }
 0x578   :  { %v895_v40 = vadd.f32 %v894_v30, %v893_v28  ;;  %v898_v42 = vadd.f32 %v897_v29, %v896_v32  ;;  %v973_v27 = vsel %vm965_vm2, %v1302_v7, 0.0 }
 0x579   :  { %v901_v43 = vadd.f32 %v900_v15, %v899_v26  ;;  %v908_v22 = vadd.f32 %v907_v41, %v906_v10  ;;  %v911_v24 = vrot.slane %v892_v34, 4  ;;  %v905_v44 = vadd.f32 %v904_v35, %v872_v46 }
 0x57a   :  { %v913_v3 = vrot.slane %v895_v40, 4  ;;  %v915_v45 = vrot.slane %v898_v42, 4  ;;  %v974_v29 = vrot.slane %v973_v27, 4  ;;  %v961_v41 = vstv %s1005_s19 }
 0x57b   :  { %v917_v47 = vrot.slane %v901_v43, 4  ;;  %v909_v48 = vadd.f32 %v908_v22, %v876_v62  ;;  %v912_v60 = vsel %vm910_vm1, %v911_v24, 1.0  ;;  %v919_v39 = vrot.slane %v905_v44, 4 }
 0x57c   :  { %v914_v37 = vsel %vm910_vm1, %v913_v3, 0.0  ;;  %v916_v50 = vsel %vm910_vm1, %v915_v45, 0.0  ;;  %v923_v52 = vmul.f32 %v912_v60, %v892_v34  ;;  %v929_v8 = vmul.f32 %v912_v60, %v898_v42 }
 0x57d   :  { %v918_v51 = vsel %vm910_vm1, %v917_v47, 1.0  ;;  %v921_v38 = vrot.slane %v909_v48, 4  ;;  %v924_v31 = vmul.f32 %v916_v50, %v895_v40  ;;  %v926_v46 = vmul.f32 %v914_v37, %v892_v34 }
 0x57e   :  { %v927_v53 = vmul.f32 %v918_v51, %v895_v40  ;;  %v920_v54 = vsel %vm910_vm1, %v919_v39, 0.0  ;;  %v930_v36 = vmul.f32 %v916_v50, %v901_v43  ;;  %v932_v55 = vmul.f32 %v914_v37, %v898_v42 }
 0x57f   :  { %v922_v56 = vsel %vm910_vm1, %v921_v38, 0.0  ;;  %v935_v58 = vmul.f32 %v920_v54, %v892_v34  ;;  %v939_v33 = vmul.f32 %v920_v54, %v898_v42  ;;  %v925_v2 = vadd.f32 %v924_v31, %v923_v52 }
 0x580   :  { %v936_v59 = vmul.f32 %v922_v56, %v895_v40  ;;  %v940_v61 = vmul.f32 %v922_v56, %v901_v43  ;;  %v928_v57 = vadd.f32 %v927_v53, %v926_v46  ;;  %v931_v62 = vadd.f32 %v930_v36, %v929_v8 }
 0x581   :  { %v933_v0 = vmul.f32 %v918_v51, %v901_v43  ;;  %v944_v63 = vmul.f32 %v943_v9, %v925_v2  ;;  %v975_v34 = vadd.f32 %v974_v29, %v973_v27 }
 0x582   :  { %v937_v1 = vadd.f32 %v936_v59, %v935_v58  ;;  %v941_v5 = vadd.f32 %v940_v61, %v939_v33  ;;  %v946_v6 = vmul.f32 %v945_v49, %v928_v57  ;;  %v949_v12 = vmul.f32 %v943_v9, %v931_v62 }
 0x583   :  { %v934_v11 = vadd.f32 %v933_v0, %v932_v55  ;;  %v976_v7 = vrot.slane %v975_v34, 2 }
 0x584   :  { %v938_v16 = vadd.f32 %v937_v1, %v905_v44  ;;  %v947_v17 = vadd.f32 %v946_v6, %v944_v63  ;;  %v942_v10 = vadd.f32 %v941_v5, %v909_v48 }
 0x585   :  { %v950_v18 = vmul.f32 %v945_v49, %v934_v11  ;;  %v977_v3 = vadd.f32 %v976_v7, %v975_v34 }
 0x586   :  { %v948_v19 = vadd.f32 %v947_v17, %v938_v16 }
 0x587   :  { %v951_v23 = vadd.f32 %v950_v18, %v949_v12  ;;  %v978_v45 = vrot.slane %v977_v3, 1 }
 0x588   :  { %v953_v25 = vrot.slane %v948_v19, 7 }
 0x589   :  { %v952_v28 = vadd.f32 %v951_v23, %v942_v10 }
 0x58a   :  { %v954_v30 = vsel %vm844_vm15, %v953_v25, %v943_v9  ;;  %v979_v9 = vadd.f32 %v978_v45, %v977_v3 }
 0x58b   :  { %v955_v32 = vrot.slane %v952_v28, 7  ;;  %v957_v26 = vmul.f32 %v954_v30, %v1408_v13 }
 0x58d   :  { %v956_v15 = vsel %vm844_vm15, %v955_v32, %v945_v49 }
 0x58e   :  { %v958_v21 = vmul.f32 %v956_v15, %v1410_v14 }
 0x590   :  { %v959_v40 = vadd.f32 %v958_v21, %v957_v26 }
 0x592   :  { %v960_v42 = vadd.f32 %v959_v40, %v1419_v20 }
 0x594   :  { %v962_v43 = vmul.f32 %v961_v41, %v960_v42  ;;  %v966_v35 = vsel %vm965_vm2, %v960_v42, 0.0 }
 0x595   :  { %v967_v22 = vrot.slane %v966_v35, 4 }
 0x596   :  { %1071 = vtanh.f32 %v962_v43 }
 0x597   :  { %v968_v24 = vadd.f32 %v967_v22, %v966_v35 }
 0x599   :  { %v969_v13 = vrot.slane %v968_v24, 2 }
 0x59b   :  { %v970_v44 = vadd.f32 %v969_v13, %v968_v24 }
 0x59d   :  { %v971_v14 = vrot.slane %v970_v44, 1 }
 0x59f   :  { %v972_v47 = vadd.f32 %v971_v14, %v970_v44 }
 0x5a0   :  { %v1072_v20 = vpop.eup %1071 }
 0x5a1   :  { %964 = vst [vmem:[#allocation5] sm:$0xff] %v1072_v20  ;;  %v981_v48 = vsel %vm980_vm3, %v972_v47, %v979_v9 }
 0x5a2   :  { %982 = vst [vmem:[%s1505_s5] sm:$0x3] %v981_v48 }
 0x5a3   :  { %1096 = shalt.err (!%p1093_p9)
}
 0x5a4   :  { %s1097_s26 = scalar_lea.hbm %s1504_s4, 128 }
 0x5a5   :  { %p1098_p10 = scmp.ne.s32.totalorder %s1504_s4, %s1097_s26  ;;  %p1101_p11 = scmp.lt.u32.totalorder %s1097_s26, %s1504_s4 }
 0x5a7   :  { %p1103_p12 = pnand %p1101_p11, %p1098_p10 }
 0x5a9   :  { %1106 = shalt.err (!%p1103_p12)
}
 0x5aa   :  { %992 = dma.vmem_to_hbm [thread:$0]  %s990_s21, 128, %s1504_s4, [#allocation3]  }
 0x5ab   :  { %1109 = dma.done.wait [#allocation3], 128  }
 0x5ac   :  { %1110 = vsyncadd [#allocation3], 4294967168 }
 0x5ad   :  { %1000 = vsyncpa [#allocation3], 1 }
 0x5ae   :  { %1001 = vsyncpa [#allocation4], 1 }

</bundles_post_ra>
